<compile_context>
chip_gen: v7x
topology: tpu7x:2x2x1
jax: 0.10.0
libtpu: 0.0.40
codegen_flags: <defaults>
</compile_context>

<pallas_src>
import functools

import jax
import jax.numpy as jnp
from jax import lax
from jax.experimental import pallas as pl
from jax.experimental.pallas import tpu as pltpu

# Deterministic stand-in for `random.random()` in the reference script.
DROPOUT_P = 0.3   # self.dropout_p; forward uses inv_scale_factor = 1/p, i.e. qk * p
# The inv_scale_factor passed to __init__ is unused by forward (it recomputes 1/p).


def _attn_dropout_kernel(q_ref, k_ref, v_ref, bits_ref, o_ref, *, p):
    # q_ref: (1, TQ, D) bf16, k_ref: (1, Lk, D) bf16, v_ref: (1, Lk, Dv) bf16,
    # bits_ref: (1, TQ, Lk) uint32, o_ref: (1, TQ, Dv) f32
    # Fold the p scale into q (TQ*D elements instead of TQ*Lk score elements).
    q = q_ref[0] * jnp.asarray(p, dtype=q_ref.dtype)
    k = k_ref[0]
    v = v_ref[0]

    # scaled_qk = (q*p) @ k^T, bf16 inputs -> f32 accumulation on the MXU.
    s = lax.dot_general(q, k, (((1,), (1,)), ((), ())),
                        preferred_element_type=jnp.float32)        # (TQ, Lk)

    # Softmax along the last dim (f32).
    m = jnp.max(s, axis=-1, keepdims=True)
    e = jnp.exp(s - m)
    denom = jnp.sum(e, axis=-1, keepdims=True)
    # Fold the dropout keep-scale 1/(1-p) into the softmax normalizer.
    inv = 1.0 / (denom * jnp.float32(1.0 - p))                      # (TQ, 1)

    # Dropout in the integer domain: drop with prob p  <=>  bits < p * 2^32.
    threshold = jnp.uint32(min(int(round(p * (2.0 ** 32))), (1 << 32) - 1))
    keep = bits_ref[0] >= threshold
    probs = jnp.where(keep, e * inv, jnp.float32(0.0))              # (TQ, Lk)

    # output = dropout_qk @ value   (bf16 inputs, f32 accumulation)
    out = jnp.dot(probs.astype(v.dtype), v, preferred_element_type=jnp.float32)
    o_ref[0] = out.astype(o_ref.dtype)


def attention_dropout(query, key, value, dropout_bits, *, p=DROPOUT_P, tq=128):
    """query: (B, Lq, D), key: (B, Lk, D), value: (B, Lk, Dv),
    dropout_bits: (B, Lq, Lk) uint32  ->  (B, Lq, Dv) float32."""
    B, Lq, D = query.shape
    Bk, Lk, Dk = key.shape
    Bv, Lkv, Dv = value.shape
    assert B == Bk == Bv and D == Dk and Lk == Lkv
    assert dropout_bits.shape == (B, Lq, Lk) and dropout_bits.dtype == jnp.uint32

    tq = min(tq, Lq)
    assert Lq % tq == 0, "Lq must be divisible by the Lq tile size"

    # bf16 matmul inputs (halves q/k/v HBM traffic; MXU-native dtype).
    q_bf = query.astype(jnp.bfloat16)
    k_bf = key.astype(jnp.bfloat16)
    v_bf = value.astype(jnp.bfloat16)

    kernel = functools.partial(_attn_dropout_kernel, p=p)
    grid = (B, Lq // tq)   # Lq-tiles innermost -> resident k/v reused per batch

    return pl.pallas_call(
        kernel,
        out_shape=jax.ShapeDtypeStruct((B, Lq, Dv), jnp.float32),
        grid=grid,
        in_specs=[
            pl.BlockSpec((1, tq, D),  lambda b, i: (b, i, 0)),
            pl.BlockSpec((1, Lk, D),  lambda b, i: (b, 0, 0)),   # independent of i
            pl.BlockSpec((1, Lk, Dv), lambda b, i: (b, 0, 0)),   # independent of i
            pl.BlockSpec((1, tq, Lk), lambda b, i: (b, i, 0)),
        ],
        out_specs=pl.BlockSpec((1, tq, Dv), lambda b, i: (b, i, 0)),
        compiler_params=pltpu.CompilerParams(
            dimension_semantics=("parallel", "arbitrary")),
    )(q_bf, k_bf, v_bf, dropout_bits)


if __name__ == "__main__":
    # The reference script's literal shapes (q:(1,64,100), k:(1,100,200)) are not
    # matmul-compatible; we keep the same rank/semantics with consistent,
    # MXU-friendly small shapes.
    B, Lq, D, Lk, Dv = 2, 256, 128, 256, 128

    k0, k1, k2, k3 = jax.random.split(jax.random.PRNGKey(0), 4)
    query = jax.random.normal(k0, (B, Lq, D), dtype=jnp.float32)
    key = jax.random.normal(k1, (B, Lk, D), dtype=jnp.float32)
    value = jax.random.normal(k2, (B, Lk, Dv), dtype=jnp.float32)
    # TODO(synk): dropout mask bits are generated host-side (in-kernel TPU PRNG
    # primitives do not lower in the interpret/CPU checker environment).
    dropout_bits = jax.random.bits(k3, (B, Lq, Lk), dtype=jnp.uint32)

    out = attention_dropout(query, key, value, dropout_bits, p=DROPOUT_P)
    out = jax.block_until_ready(out)

    assert out.shape == (B, Lq, Dv) and out.dtype == jnp.float32
    assert bool(jnp.all(jnp.isfinite(out)))
    print("KERNEL_OK")
</pallas_src>

<mosaic_0001>
module attributes {stable_mosaic.version = 11 : i64} {
  func.func @_attn_dropout_kernel(%arg0: i32, %arg1: i32, %arg2: memref<1x128x128xbf16, #tpu.memory_space<vmem>>, %arg3: memref<1x256x128xbf16, #tpu.memory_space<vmem>>, %arg4: memref<1x256x128xbf16, #tpu.memory_space<vmem>>, %arg5: memref<1x128x256xi32, #tpu.memory_space<vmem>>, %arg6: memref<1x128x128xf32, #tpu.memory_space<vmem>>) attributes {dimension_semantics = [#tpu.dimension_semantics<parallel>, #tpu.dimension_semantics<arbitrary>], iteration_bounds = array<i64: 2, 2>, scalar_prefetch = 0 : i64, scratch_operands = 0 : i64, tpu.core_type = #tpu.core_type<tc>, window_params = [{transform_indices = @transform_0, window_bounds = array<i64: 1, 128, 128>}, {transform_indices = @transform_1, window_bounds = array<i64: 1, 256, 128>}, {transform_indices = @transform_2, window_bounds = array<i64: 1, 256, 128>}, {transform_indices = @transform_3, window_bounds = array<i64: 1, 128, 256>}, {transform_indices = @transform_4, window_bounds = array<i64: 1, 128, 128>}]} {
    %c0 = arith.constant 0 : index
    %c0_0 = arith.constant 0 : index
    %c0_1 = arith.constant 0 : index
    %0 = vector.load %arg2[%c0, %c0_0, %c0_1] : memref<1x128x128xbf16, #tpu.memory_space<vmem>>, vector<1x128x128xbf16>
    %1 = vector.shape_cast %0 : vector<1x128x128xbf16> to vector<128x128xbf16>
    %cst = arith.constant 3.007810e-01 : bf16
    %2 = vector.broadcast %cst : bf16 to vector<128x128xbf16>
    %3 = arith.mulf %1, %2 : vector<128x128xbf16>
    %c0_2 = arith.constant 0 : index
    %c0_3 = arith.constant 0 : index
    %c0_4 = arith.constant 0 : index
    %4 = vector.load %arg3[%c0_2, %c0_3, %c0_4] : memref<1x256x128xbf16, #tpu.memory_space<vmem>>, vector<1x256x128xbf16>
    %5 = vector.shape_cast %4 : vector<1x256x128xbf16> to vector<256x128xbf16>
    %c0_5 = arith.constant 0 : index
    %c0_6 = arith.constant 0 : index
    %c0_7 = arith.constant 0 : index
    %6 = vector.load %arg4[%c0_5, %c0_6, %c0_7] : memref<1x256x128xbf16, #tpu.memory_space<vmem>>, vector<1x256x128xbf16>
    %7 = vector.shape_cast %6 : vector<1x256x128xbf16> to vector<256x128xbf16>
    %cst_8 = arith.constant dense<0.000000e+00> : vector<128x256xf32>
    %8 = tpu.matmul %3, %5, %cst_8 {dimension_numbers = #tpu.dot_dimension_numbers<[1], [1], [0], [0], [0, 0, 1, 0], [], []>} : vector<128x128xbf16>, vector<256x128xbf16>, vector<128x256xf32> -> vector<128x256xf32>
    %cst_9 = arith.constant dense<0xFF800000> : vector<128xf32>
    %9 = vector.multi_reduction <maximumf>, %8, %cst_9 [1] : vector<128x256xf32> to vector<128xf32>
    %10 = vector.shape_cast %9 : vector<128xf32> to vector<128x1xf32>
    %11 = vector.broadcast %10 : vector<128x1xf32> to vector<128x256xf32>
    %12 = arith.subf %8, %11 : vector<128x256xf32>
    %13 = math.exp %12 : vector<128x256xf32>
    %cst_10 = arith.constant dense<0.000000e+00> : vector<128xf32>
    %14 = vector.multi_reduction <add>, %13, %cst_10 [1] : vector<128x256xf32> to vector<128xf32>
    %15 = vector.shape_cast %14 : vector<128xf32> to vector<128x1xf32>
    %cst_11 = arith.constant 0.699999988 : f32
    %16 = vector.broadcast %cst_11 : f32 to vector<128x1xf32>
    %17 = arith.mulf %15, %16 : vector<128x1xf32>
    %cst_12 = arith.constant 1.000000e+00 : f32
    %18 = vector.broadcast %cst_12 : f32 to vector<128x1xf32>
    %19 = arith.divf %18, %17 : vector<128x1xf32>
    %c0_13 = arith.constant 0 : index
    %c0_14 = arith.constant 0 : index
    %c0_15 = arith.constant 0 : index
    %20 = vector.load %arg5[%c0_13, %c0_14, %c0_15] : memref<1x128x256xi32, #tpu.memory_space<vmem>>, vector<1x128x256xi32>
    %21 = vector.shape_cast %20 : vector<1x128x256xi32> to vector<128x256xi32>
    %c1288490189_i32 = arith.constant 1288490189 : i32
    %22 = vector.broadcast %c1288490189_i32 : i32 to vector<128x256xi32>
    %23 = arith.cmpi uge, %21, %22 : vector<128x256xi32>
    %24 = vector.broadcast %19 : vector<128x1xf32> to vector<128x256xf32>
    %25 = arith.mulf %13, %24 : vector<128x256xf32>
    %cst_16 = arith.constant 0.000000e+00 : f32
    %26 = vector.broadcast %cst_16 : f32 to vector<128x256xf32>
    %27 = arith.select %23, %25, %26 : vector<128x256xi1>, vector<128x256xf32>
    %28 = arith.truncf %27 : vector<128x256xf32> to vector<128x256xbf16>
    %cst_17 = arith.constant dense<0.000000e+00> : vector<128x128xf32>
    %29 = tpu.matmul %28, %7, %cst_17 {dimension_numbers = #tpu.dot_dimension_numbers<[1], [0], [0], [1], [0, 0, 1, 1], [], []>} : vector<128x256xbf16>, vector<256x128xbf16>, vector<128x128xf32> -> vector<128x128xf32>
    %c0_18 = arith.constant 0 : index
    %c0_19 = arith.constant 0 : index
    %c0_20 = arith.constant 0 : index
    %30 = vector.load %arg6[%c0_18, %c0_19, %c0_20] : memref<1x128x128xf32, #tpu.memory_space<vmem>>, vector<1x128x128xf32>
    %31 = vector.shape_cast %30 : vector<1x128x128xf32> to vector<128x128xf32>
    %32 = vector.shape_cast %29 : vector<128x128xf32> to vector<1x128x128xf32>
    tpu.vector_store %arg6[%c0_18, %c0_19, %c0_20], %32 {strides = array<i32>} : memref<1x128x128xf32, #tpu.memory_space<vmem>>, vector<1x128x128xf32>,
    return
  }
  func.func @transform_0(%arg0: i32, %arg1: i32) -> (i32, i32, i32) {
    %c0_i32 = arith.constant 0 : i32
    %c0_i32_0 = arith.constant 0 : i32
    return %arg0, %arg1, %c0_i32 : i32, i32, i32
  }
  func.func @transform_1(%arg0: i32, %arg1: i32) -> (i32, i32, i32) {
    %c0_i32 = arith.constant 0 : i32
    %c0_i32_0 = arith.constant 0 : i32
    %c0_i32_1 = arith.constant 0 : i32
    return %arg0, %c0_i32, %c0_i32_0 : i32, i32, i32
  }
  func.func @transform_2(%arg0: i32, %arg1: i32) -> (i32, i32, i32) {
    %c0_i32 = arith.constant 0 : i32
    %c0_i32_0 = arith.constant 0 : i32
    %c0_i32_1 = arith.constant 0 : i32
    return %arg0, %c0_i32, %c0_i32_0 : i32, i32, i32
  }
  func.func @transform_3(%arg0: i32, %arg1: i32) -> (i32, i32, i32) {
    %c0_i32 = arith.constant 0 : i32
    %c0_i32_0 = arith.constant 0 : i32
    return %arg0, %arg1, %c0_i32 : i32, i32, i32
  }
  func.func @transform_4(%arg0: i32, %arg1: i32) -> (i32, i32, i32) {
    %c0_i32 = arith.constant 0 : i32
    %c0_i32_0 = arith.constant 0 : i32
    return %arg0, %arg1, %c0_i32 : i32, i32, i32
  }
}

</mosaic_0001>

<bundles_post_ra>
// kernel: tpu_custom_call.1
= control target key start
LH: loop header
LB: loop body
LE: loop exit
PB: predicated region body
PF: predicated region fallthrough
CT: control target
= control target key end

     0   :  { %s2993_s0 = inlined_call_operand.hbm [shape: bf16[2,256,128], index: 0, kind: input, shape index: {}]   ;;  %s2994_s1 = inlined_call_operand.hbm [shape: bf16[2,256,128], index: 1, kind: input, shape index: {}]   ;;  %s2995_s2 = inlined_call_operand.hbm [shape: bf16[2,256,128], index: 2, kind: input, shape index: {}]   ;;  %s2996_s3 = inlined_call_operand.hbm [shape: u32[2,256,256], index: 3, kind: input, shape index: {}]   ;;  %s2997_s4 = inlined_call_operand.hbm [shape: f32[2,256,128], index: 4, kind: output, shape index: {}]  }
   0x1   :  { %3020 = sst [smem:[#allocation24_spill]] %s2993_s0 }
   0x2   :  { %3021 = sst [smem:[#allocation25_spill]] %s2994_s1 }
   0x3   :  { %3022 = sst [smem:[#allocation26_spill]] %s2997_s4 }
   0x4   :  { %9 = vsyncpa [#allocation3], 0 }
   0x5   :  { %11 = vsyncpa [#allocation3 + $0x1], 0 }
   0x6   :  { %12 = vsyncpa [#allocation6], 0 }
   0x7   :  { %14 = vsyncpa [#allocation6 + $0x1], 0 }
   0x8   :  { %15 = vsyncpa [#allocation9], 0 }
   0x9   :  { %17 = vsyncpa [#allocation9 + $0x1], 0 }
   0xa   :  { %18 = vsyncpa [#allocation4], 0 }
   0xb   :  { %20 = vsyncpa [#allocation4 + $0x1], 0  ;;  %s2239_s15 = smov 0   ;;  %s2241_s16 = smov 0  }
   0xc   :  { %s2243_s17 = smov 0   ;;  %s2245_s18 = smov 0  }
   0xd   :  { %s2247_s19 = smov 0   ;;  %s2249_s20 = smov 0  }
   0xe   :  { %s2251_s21 = smov 0   ;;  %s2253_s22 = smov 0  }
   0xf   :  { %s2255_s23 = smov 0   ;;  %s2257_s24 = smov 0  }
  0x10   :  { %s2259_s25 = smov 0  }
  0x11 LB: > { %3023 = sst [smem:[#allocation15_spill]] %s2165_s16  ;;  %s2293_s26 = sadd.s32 4294967295, %s2201_s25   ;;  %s2201_s25 = sphi %s2259_s25, %s26_s25   ;;  %s2197_s24 = sphi %s2257_s24, %s3078_s24   ;;  %s2193_s23 = sphi %s2255_s23, %s3077_s23   ;;  %s2189_s22 = sphi %s2253_s22, %s3076_s22   ;;  %s2185_s21 = sphi %s2251_s21, %s3075_s21   ;;  %s2181_s20 = sphi %s2249_s20, %s3074_s20   ;;  %s2177_s19 = sphi %s2247_s19, %s3073_s19   ;;  %s2173_s18 = sphi %s2245_s18, %s3072_s18   ;;  %s2169_s17 = sphi %s2243_s17, %s3071_s17   ;;  %s2165_s16 = sphi %s2241_s16, %s3070_s16   ;;  %s2161_s15 = sphi %s2239_s15, %s3067_s15  }
  0x12   : > { %3024 = sst [smem:[#allocation16_spill]] %s2173_s18  ;;  %p3001_p0 = scmp.eq.s32.totalorder %s2201_s25, 0 }
  0x13   : > { %3025 = sst [smem:[#allocation17_spill]] %s2185_s21  ;;  %p3000_p1 = scmp.eq.s32.totalorder %s2293_s26, 0 }
  0x14   : > { %3026 = sst [smem:[#allocation18_spill]] %s2189_s22  ;;  %p80_p2 = scmp.ne.s32.totalorder %s2169_s17, %s2165_s16 }
  0x15   : > { %3027 = sst [smem:[#allocation19_spill]] %s2293_s26  ;;  %p86_p3 = scmp.ne.s32.totalorder %s2165_s16, %s2161_s15 }
  0x16   : > { %p2999_p4 = scmp.lt.s32.totalorder %s2201_s25, 4  ;;  %p82_p5 = por %p80_p2, %p3001_p0 }
  0x17   : > { %p2306_p6 = por %p86_p3, %p3000_p1  ;;  %s215_s29 = sand.u32 1, %s2201_s25  }
  0x18   : > { %s217_s30 = sand.u32 1, %s2169_s17   ;;  %s1601_s6 = sshll.u32 %s2197_s24, 11 }
  0x19   : > { %s3028_s28 = scalar_select %p2306_p6, 1, 0 }
  0x1a   : > { %s1490_s5 = sshll.u32 %s217_s30, 7  ;;  %s3030_s1 = sld [smem:[#allocation25_spill]] }
  0x1b   : > { %3029 = sst [smem:[#allocation20_spill]] %s3028_s28  ;;  %s219_s10 = scalar_lea.vmem [#allocation5], %s1490_s5 }
  0x1c   : > { %s226_s11 = sshll.u32 %s219_s10, 4  ;;  %p2322_p7 = pnand %p2999_p4, %p82_p5  ;;  %s2318_s11 = int_to_ptr.vmem [resolvable:$true] %s226_s11 }
  0x1d   : > { %s2329_s15 = scalar_lea.hbm %s2995_s2, %s1601_s6  ;;  %s240_s30 = scalar_lea.vmem [#allocation7], %s1490_s5 }
  0x1e   : > { %s2331_s7 = sshll.u32 %s240_s30, 4  ;;  %s2333_s8 = scalar_lea.sflag [#allocation6], %s215_s29  ;;  %s2365_s7 = int_to_ptr.vmem [resolvable:$true] %s2331_s7 }
  0x1f   : > { %p3006_p9 = pneg %p2322_p7 }
  0x20   : > { %s2316_s9 = scalar_lea.hbm %s3030_s1, %s1601_s6  ;;  %s1956_s13 = scalar_lea.hbm %s3030_s1, 4096 }
  0x21   : > { %s1951_s10 = scalar_lea.hbm %s2316_s9, 2048  ;;  %p1957_p12 = scmp.lt.u32.totalorder %s2316_s9, %s3030_s1 }
  0x22   : > { %p1952_p8 = scmp.ne.s32.totalorder %s2316_s9, %s1951_s10  ;;  %p1958_p13 = scmp.lt.u32.totalorder %s1956_s13, %s1951_s10 }
  0x23   : > { %p1960_p3 = scmp.lt.u32.totalorder %s1951_s10, %s2316_s9 }
  0x24   : > { %p1954_p10 = pnand %p3006_p9, %p1952_p8  ;;  %p1959_p2 = por %p1958_p13, %p1957_p12 }
  0x26   : > { %p1955_p11 = pneg %p1954_p10  ;;  %p1961_p5 = por %p1960_p3, %p1959_p2 }
  0x28   : > { %p1962_p4 = pnand %p1961_p5, %p1955_p11 }
  0x2a   : > { %1965 = shalt.err (!%p1962_p4)
}
  0x2b   : > { %s1966_s29 = scalar_lea.vmem %s2318_s11, 2048  ;;  %s2203_s4 = smov [#allocation5]  }
  0x2c   : > { %p1967_p8 = scmp.ne.s32.totalorder %s2318_s11, %s1966_s29  ;;  %s1971_s27 = sshll.u32 %s2203_s4, 4  ;;  %s1972_s27 = int_to_ptr.vmem [resolvable:$false] %s1971_s27 }
  0x2d   : > { %s1973_s5 = scalar_lea.vmem %s1972_s27, 4096  ;;  %p1974_p0 = scmp.lt.s32.totalorder %s2318_s11, %s1972_s27 }
  0x2e   : > { %p1969_p10 = pnand %p1967_p8, %p3006_p9  ;;  %p1975_p12 = scmp.lt.s32.totalorder %s1973_s5, %s1966_s29 }
  0x30   : > { %p1970_p1 = pneg %p1969_p10  ;;  %p1976_p13 = por %p1975_p12, %p1974_p0 }
  0x32   : > { %p1977_p2 = pnand %p1976_p13, %p1970_p1 }
  0x34   : > { %1980 = shalt.err (!%p1977_p2)
}
  0x35   : > { %s3002_s30 = smov 64   ;;  %s3004_s10 = smov 4  }
  0x36   : > { %1716 = dma.hbm_to_vmem [thread:$0]  (!%p2322_p7), %s2316_s9, 2048, %s2318_s11, %s2333_s8, %s3002_s30, %s3002_s30, %s3004_s10  }
  0x37   : > { %p1501_p0 = scmp.ge.s32.totalorder %s2201_s25, 1  ;;  %p279_p1 = scmp.lt.s32.totalorder %s2201_s25, 5 }
  0x38   : > { %s1483_s14 = sadd.s32 4294967294, %s2201_s25   ;;  %s35_s6 = sadd.s32 1, %s2193_s23 }
  0x39   : > { %p2369_p4 = pnand %p1501_p0, %p279_p1  ;;  %p36_p11 = scmp.ge.s32.totalorder %s35_s6, 2 }
  0x3a   : > { %s38_s29 = sadd.s32 1, %s2197_s24  ;;  %s47_s4 = sadd.s32 1, %s2181_s20 }
  0x3b   : > { %s3032_s13 = scalar_select %p2369_p4, 1, 0 }
  0x3c   : > { %p54_p3 = scmp.ne.s32.totalorder %s2181_s20, %s2177_s19  ;;  %s3080_s6 = smov (%p36_p11, %s35_s6), 0 }
  0x3d   : > { %3033 = sst [smem:[#allocation21_spill]] %s3080_s6  ;;  %s3082_s29 = smov (!%p36_p11, %s38_s29), %s2197_s24 }
  0x3e   : > { %s43_s9 = ssub.s32 %s2193_s23, %s3080_s6  ;;  %p3034_p5 = scmp.eq.s32.totalorder %s2201_s25, 0 }
  0x3f   : > { %p40_p10 = scmp.ge.s32.totalorder %s3082_s29, 2  ;;  %p60_p12 = scmp.ne.s32.totalorder %s2177_s19, %s2173_s18 }
  0x40   : > { %p2386_p8 = por %p3034_p5, %p54_p3  ;;  %p166_p13 = scmp.eq.s32.totalorder %s2293_s26, 3 }
  0x41   : > { %p172_p2 = scmp.eq.s32.totalorder %s1483_s14, 3  ;;  %s3084_s29 = smov (%p40_p10, %s3082_s29), 0 }
  0x42   : > { %3036 = sst [smem:[#allocation22_spill]] %s3084_s29  ;;  %p3037_p0 = scmp.eq.s32.totalorder %s2293_s26, 0 }
  0x43   : > { %p2401_p11 = por %p166_p13, %p54_p3  ;;  %s42_s30 = ssub.s32 %s2197_s24, %s3084_s29 }
  0x44   : > { %p2397_p1 = por %p3037_p0, %p60_p12  ;;  %p2407_p5 = por %p172_p2, %p60_p12 }
  0x45   : > { %s3039_s5 = scalar_select %p2401_p11, 1, 0 }
  0x46   : > { %s3038_s27 = scalar_select %p2397_p1, 1, 0 }
  0x47   : > { %3040 = sst [smem:[#allocation23_spill]] %s3039_s5  ;;  %s44_s14 = sor.u32 %s43_s9, %s42_s30 }
  0x48   : > { %s3041_s10 = scalar_select %p2407_p5, 1, 0 }
  0x49   : > { %p71_p10 = scmp.eq.s32.totalorder %s42_s30, 0  ;;  %p45_p9 = scmp.eq.s32.totalorder %s44_s14, 0 }
  0x4a   : > { %s2412_s1 = sand.u32 1, %s2181_s20   ;;  %s3042_s6 = sadd.s32 1, %s2169_s17 }
  0x4b   : > { %s2417_s18 = scalar_select %p71_p10, %s2169_s17, %s3042_s6  }
  0x4c   : > { %s2420_s22 = scalar_select %p45_p9, %s2181_s20, %s47_s4  }
  0x4d   : > { %s1486_s29 = sshll.u32 %s2412_s1, 6  ;;  %s1487_s5 = sshll.u32 %s2193_s23, 4 }
  0x4e   : > { %s1488_s21 = sshll.u32 %s2197_s24, 5  ;;  %s196_s28 = scalar_lea.vmem [#allocation2], %s1486_s29 }
  0x4f   : > { %s205_s16 = sshll.u32 %s196_s28, 4  ;;  %s202_s26 = sadd.s32 %s1488_s21, %s1487_s5  ;;  %s2425_s16 = int_to_ptr.vmem [resolvable:$true] %s205_s16 }
  0x50   : > { %s1489_s30 = sshll.u32 %s202_s26, 6  ;;  %p3043_p3 = scmp.lt.s32.totalorder %s2201_s25, 4 }
  0x51   : > { %s3045_s0 = sld [smem:[#allocation24_spill]]  ;;  %s193_s28 = scalar_lea.sflag [#allocation3], %s2412_s1 }
  0x52   : > { %p2431_p12 = pnand %p3043_p3, %p2386_p8 }
  0x54   : > { %p3019_p8 = pneg %p2431_p12 }
  0x57   : > { %s2438_s4 = scalar_lea.hbm %s3045_s0, %s1489_s30  ;;  %s1986_s5 = scalar_lea.hbm %s3045_s0, 4096 }
  0x58   : > { %s1981_s26 = scalar_lea.hbm %s2438_s4, 1024  ;;  %p1987_p0 = scmp.lt.u32.totalorder %s2438_s4, %s3045_s0 }
  0x59   : > { %p1982_p9 = scmp.ne.s32.totalorder %s2438_s4, %s1981_s26  ;;  %p1988_p10 = scmp.lt.u32.totalorder %s1986_s5, %s1981_s26 }
  0x5a   : > { %p1990_p5 = scmp.lt.u32.totalorder %s1981_s26, %s2438_s4 }
  0x5b   : > { %p1984_p13 = pnand %p3019_p8, %p1982_p9  ;;  %p1989_p3 = por %p1988_p10, %p1987_p0 }
  0x5d   : > { %p1985_p2 = pneg %p1984_p13  ;;  %p1991_p11 = por %p1990_p5, %p1989_p3 }
  0x5f   : > { %p1992_p6 = pnand %p1991_p11, %p1985_p2 }
  0x61   : > { %1995 = shalt.err (!%p1992_p6)
}
  0x62   : > { %s1996_s6 = scalar_lea.vmem %s2425_s16, 1024  ;;  %s2206_s29 = smov [#allocation2]  }
  0x63   : > { %p1997_p9 = scmp.ne.s32.totalorder %s2425_s16, %s1996_s6  ;;  %s2001_s11 = sshll.u32 %s2206_s29, 4  ;;  %s2002_s11 = int_to_ptr.vmem [resolvable:$false] %s2001_s11 }
  0x64   : > { %s2003_s30 = scalar_lea.vmem %s2002_s11, 2048  ;;  %p2004_p4 = scmp.lt.s32.totalorder %s2425_s16, %s2002_s11 }
  0x65   : > { %p1999_p13 = pnand %p1997_p9, %p3019_p8  ;;  %p2005_p0 = scmp.lt.s32.totalorder %s2003_s30, %s1996_s6 }
  0x67   : > { %p2000_p1 = pneg %p1999_p13  ;;  %p2006_p10 = por %p2005_p0, %p2004_p4 }
  0x69   : > { %p2007_p5 = pnand %p2006_p10, %p2000_p1 }
  0x6b   : > { %2010 = shalt.err (!%p2007_p5)
}
  0x6c   : > { %s3046_s26 = smov 4   ;;  %s3047_s5 = smov 64  }
  0x6d   : > { %1713 = dma.hbm_to_vmem [thread:$0]  (!%p2431_p12), %s2438_s4, 1024, %s2425_s16, %s193_s28, %s3047_s5, %s3047_s5, %s3046_s26  }
  0x6e   : > { %s2011_s14 = scalar_lea.hbm %s2329_s15, 2048  ;;  %p3048_p4 = pneg %p2322_p7 }
  0x6f   : > { %p2012_p6 = scmp.ne.s32.totalorder %s2329_s15, %s2011_s14  ;;  %s2016_s11 = scalar_lea.hbm %s2995_s2, 4096 }
  0x70   : > { %p2017_p2 = scmp.lt.u32.totalorder %s2329_s15, %s2995_s2  ;;  %p2018_p3 = scmp.lt.u32.totalorder %s2016_s11, %s2011_s14 }
  0x71   : > { %p2014_p1 = pnand %p2012_p6, %p3048_p4  ;;  %p2020_p13 = scmp.lt.u32.totalorder %s2011_s14, %s2329_s15 }
  0x72   : > { %p2019_p9 = por %p2018_p3, %p2017_p2 }
  0x73   : > { %p2015_p11 = pneg %p2014_p1 }
  0x74   : > { %p2021_p0 = por %p2020_p13, %p2019_p9 }
  0x76   : > { %p2022_p10 = pnand %p2021_p0, %p2015_p11 }
  0x78   : > { %2025 = shalt.err (!%p2022_p10)
}
  0x79   : > { %s2026_s16 = scalar_lea.vmem %s2365_s7, 2048  ;;  %p3049_p6 = pmov %p3048_p4 }
  0x7a   : > { %p2027_p5 = scmp.ne.s32.totalorder %s2365_s7, %s2026_s16  ;;  %s2207_s4 = smov [#allocation7]  }
  0x7b   : > { %s2031_s28 = sshll.u32 %s2207_s4, 4  ;;  %s2032_s28 = int_to_ptr.vmem [resolvable:$false] %s2031_s28 }
  0x7c   : > { %p2029_p4 = pnand %p2027_p5, %p3049_p6  ;;  %s2033_s21 = scalar_lea.vmem %s2032_s28, 4096 }
  0x7d   : > { %p2034_p8 = scmp.lt.s32.totalorder %s2365_s7, %s2032_s28  ;;  %p2035_p2 = scmp.lt.s32.totalorder %s2033_s21, %s2026_s16 }
  0x7e   : > { %p2030_p1 = pneg %p2029_p4 }
  0x7f   : > { %p2036_p3 = por %p2035_p2, %p2034_p8 }
  0x81   : > { %p2037_p9 = pnand %p2036_p3, %p2030_p1 }
  0x83   : > { %2040 = shalt.err (!%p2037_p9)
}
  0x84   : > { %1719 = dma.hbm_to_vmem [thread:$0]  (!%p2322_p7), %s2329_s15, 2048, %s2365_s7, %s2333_s8, %s3047_s5, %s3047_s5, %s3046_s26  }
  0x85   : > { %s1603_s14 = sshll.u32 %s2193_s23, 5  ;;  %s1499_s6 = sshll.u32 %s2197_s24, 6 }
  0x86   : > { %s3050_s29 = sshll.u32 %s2412_s1, 8  ;;  %s268_s16 = sadd.s32 %s1603_s14, %s1499_s6 }
  0x87   : > { %s261_s11 = scalar_lea.vmem [#allocation8], %s3050_s29  ;;  %s1500_s12 = sshll.u32 %s268_s16, 7 }
  0x88   : > { %s271_s30 = sshll.u32 %s261_s11, 4  ;;  %s2508_s21 = scalar_lea.hbm %s2996_s3, %s1500_s12  ;;  %s2503_s30 = int_to_ptr.vmem [resolvable:$true] %s271_s30 }
  0x89   : > { %s258_s0 = scalar_lea.sflag [#allocation9], %s2412_s1  ;;  %s2041_s15 = scalar_lea.hbm %s2508_s21, 4096 }
  0x8a   : > { %p2042_p7 = scmp.ne.s32.totalorder %s2508_s21, %s2041_s15  ;;  %p3051_p8 = pneg %p2431_p12 }
  0x8b   : > { %s2046_s26 = scalar_lea.hbm %s2996_s3, 16384  ;;  %p2047_p0 = scmp.lt.u32.totalorder %s2508_s21, %s2996_s3 }
  0x8c   : > { %p2044_p11 = pnand %p2042_p7, %p3051_p8  ;;  %p2048_p10 = scmp.lt.u32.totalorder %s2046_s26, %s2041_s15 }
  0x8d   : > { %p2050_p6 = scmp.lt.u32.totalorder %s2041_s15, %s2508_s21 }
  0x8e   : > { %p2045_p13 = pneg %p2044_p11  ;;  %p2049_p5 = por %p2048_p10, %p2047_p0 }
  0x90   : > { %p2051_p4 = por %p2050_p6, %p2049_p5 }
  0x92   : > { %p2052_p1 = pnand %p2051_p4, %p2045_p13 }
  0x94   : > { %2055 = shalt.err (!%p2052_p1)
}
  0x95   : > { %s2056_s6 = scalar_lea.vmem %s2503_s30, 4096  ;;  %p3052_p3 = pmov %p3051_p8 }
  0x96   : > { %p2057_p2 = scmp.ne.s32.totalorder %s2503_s30, %s2056_s6  ;;  %s2208_s29 = smov [#allocation8]  }
  0x97   : > { %s2061_s11 = sshll.u32 %s2208_s29, 4  ;;  %s2062_s11 = int_to_ptr.vmem [resolvable:$false] %s2061_s11 }
  0x98   : > { %p2059_p9 = pnand %p2057_p2, %p3052_p3  ;;  %s2063_s16 = scalar_lea.vmem %s2062_s11, 8192 }
  0x99   : > { %p2064_p8 = scmp.lt.s32.totalorder %s2503_s30, %s2062_s11  ;;  %p2065_p11 = scmp.lt.s32.totalorder %s2063_s16, %s2056_s6 }
  0x9a   : > { %p2060_p7 = pneg %p2059_p9 }
  0x9b   : > { %p2066_p0 = por %p2065_p11, %p2064_p8 }
  0x9d   : > { %p2067_p10 = pnand %p2066_p0, %p2060_p7 }
  0x9f   : > { %2070 = shalt.err (!%p2067_p10)
}
  0xa0   : > { %s2209_s12 = smov 256   ;;  %s2210_s4 = smov 16  }
  0xa1   : > { %1722 = dma.hbm_to_vmem [thread:$0]  (!%p2431_p12), %s2508_s21, 4096, %s2503_s30, %s258_s0, %s2209_s12, %s2209_s12, %s2210_s4  }
  0xa2   : > { %p3053_p13 = scmp.ne.s32.totalorder %s3032_s13, 0 }
  0xa3   : > { %s2539_s28 = sand.u32 (!%p3053_p13), 1, %s2177_s19   ;;  %p3054_p5 = scmp.ne.s32.totalorder (!%p3053_p13), %s3038_s27, 0 }
  0xa4   : > { %283 = sbr.rel (%p3053_p13) target bundleno = 1078 (0x436), region = 36  ;;  %s1502_s15 = sshll.u32 (!%p3053_p13), %s2539_s28, 6 }
  0xa5   : > { %s286_s7 = scalar_lea.sflag (!%p3053_p13), [#allocation3], %s2539_s28  ;;  %s2543_s8 = scalar_lea.vmem (!%p3053_p13), [#allocation2], %s1502_s15 }
  0xab   : > { %2144 = dma.done.wait (%p3054_p5), %s286_s7, 1024  }
  0xac   : > { %2146 = vsyncadd (%p3054_p5), %s286_s7, 4294966272  ;;  %s3055_s1 = sld [smem:[#allocation19_spill]]  ;;  %s3056_s0 = sld [smem:[#allocation15_spill]] }
  0xad   : > { %s3057_s9 = sld [smem:[#allocation20_spill]] }
  0xb2   : > { %s294_s13 = sand.u32 1, %s3055_s1   ;;  %s296_s30 = sand.u32 1, %s3056_s0  }
  0xb3   : > { %s1503_s21 = sshll.u32 %s296_s30, 7  ;;  %s295_s26 = scalar_lea.sflag [#allocation6], %s294_s13 }
  0xb4   : > { %s2551_s5 = scalar_lea.vmem [#allocation5], %s1503_s21  ;;  %p3058_p12 = scmp.ne.s32.totalorder %s3057_s9, 0 }
  0xb6   : > { %2148 = dma.done.wait (%p3058_p12), %s295_s26, 4096  }
  0xb7   : > { %2150 = vsyncadd (%p3058_p12), %s295_s26, 4294963200  ;;  %s1505_s14 = sshll.u32 %s2539_s28, 8  ;;  %s2558_s6 = scalar_lea.vmem [#allocation7], %s1503_s21 }
  0xb8   : > { %s313_s29 = scalar_lea.sflag [#allocation9], %s2539_s28  ;;  %s2561_s11 = scalar_lea.vmem [#allocation8], %s1505_s14 }
  0xb9   : > { %2152 = dma.done.wait (%p3054_p5), %s313_s29, 4096  }
  0xba   : > { %2154 = vsyncadd (%p3054_p5), %s313_s29, 4294963200  ;;  %v1823_v0 = vld [vmem:[%s2551_s5 + $0x40] sm:$0xff]   ;;  %v1825_v2 = vld [vmem:[%s2551_s5 + $0x48] sm:$0xff]   ;;  %s1506_s27 = sshll.u32 %s2539_s28, 7  ;;  %s3059_s12 = sld [smem:[#allocation17_spill]] }
  0xbb   : > { %v1824_v1 = vld [vmem:[%s2551_s5] sm:$0xff]   ;;  %1604 = vmatprep.subr.bf16.mxu0 %v1823_v0  ;;  %v1826_v3 = vld [vmem:[%s2551_s5 + $0x8] sm:$0xff]   ;;  %v1827_v4 = vld [vmem:[%s2551_s5 + $0x50] sm:$0xff]   ;;  %s2904_s16 = scalar_lea.vmem [#allocation10], %s1506_s27  ;;  %s3060_s4 = sld [smem:[#allocation18_spill]] }
  0xbc   : > { %1605 = vmatpush3.bf16.xpose.msra.mxu0 %v1824_v1  ;;  %v1828_v5 = vld [vmem:[%s2551_s5 + $0x10] sm:$0xff]   ;;  %v1829_v6 = vld [vmem:[%s2551_s5 + $0x58] sm:$0xff]   ;;  %v361_v7 = vld [vmem:[%s2543_s8] sm:$0xf]  ;;  %s3061_s1 = sld [smem:[#allocation23_spill]]  ;;  %s1323_s9 = sshll.u32 %s2904_s16, 4  ;;  %s2928_s9 = int_to_ptr.vmem [resolvable:$true] %s1323_s9 }
  0xbd   : > { %1606 = vmatprep.subr.bf16.mxu0 %v1825_v2  ;;  %v362_v8 = vld [vmem:[%s2543_s8 + $0x4] sm:$0xf]  ;;  %v377_v9 = vmul.bf16 1050295962, %v361_v7  ;;  %v1830_v12 = vld [vmem:[%s2551_s5 + $0x18] sm:$0xff]   ;;  %v1833_v15 = vld [vmem:[%s2551_s5 + $0x68] sm:$0xff]  }
  0xbe   : > { %v378_v10 = vmul.bf16 1050295962, %v362_v8  ;;  %v1831_v13 = vld [vmem:[%s2551_s5 + $0x60] sm:$0xff]   ;;  %v1834_v16 = vld [vmem:[%s2551_s5 + $0x28] sm:$0xff]   ;;  %v1835_v17 = vld [vmem:[%s2551_s5 + $0x70] sm:$0xff]   ;;  %s3062_s21 = sld [smem:[#allocation26_spill]] }
  0xbf   : > { %v1832_v14 = vld [vmem:[%s2551_s5 + $0x20] sm:$0xff]   ;;  %v1836_v18 = vld [vmem:[%s2551_s5 + $0x30] sm:$0xff]   ;;  %v1837_v19 = vld [vmem:[%s2551_s5 + $0x78] sm:$0xff]   ;;  %s1308_s14 = scalar_lea.sflag [#allocation4], %s2539_s28  ;;  %s2211_s29 = smov [#allocation10]  }
  0xc0   : > { %v1507_v11 = vcombine.low %v377_v9, %v378_v10  ;;  %v1838_v20 = vld [vmem:[%s2551_s5 + $0x38] sm:$0xff]   ;;  %v363_v21 = vld [vmem:[%s2543_s8 + $0x8] sm:$0xf]  ;;  %v364_v22 = vld [vmem:[%s2543_s8 + $0xc] sm:$0xf]  ;;  %s1596_s15 = sshll.u32 %s3059_s12, 4 }
  0xc1   : > { %v379_v23 = vmul.bf16 1050295962, %v363_v21  ;;  %v380_v24 = vmul.bf16 1050295962, %v364_v22  ;;  %v365_v26 = vld [vmem:[%s2543_s8 + $0x10] sm:$0xf] }
  0xc2   : > { %1620 = vmatprep.mubr.bf16.mxu0 %v1507_v11  ;;  %v366_v27 = vld [vmem:[%s2543_s8 + $0x14] sm:$0xf]  ;;  %v381_v28 = vmul.bf16 1050295962, %v365_v26  ;;  %v367_v31 = vld [vmem:[%s2543_s8 + $0x18] sm:$0xf] }
  0xc3   : > { %v1508_v25 = vcombine.low %v379_v23, %v380_v24  ;;  %v382_v29 = vmul.bf16 1050295962, %v366_v27  ;;  %v368_v32 = vld [vmem:[%s2543_s8 + $0x1c] sm:$0xf]  ;;  %v383_v33 = vmul.bf16 1050295962, %v367_v31 }
  0xc4   : > { %1607 = vmatpush3.bf16.xpose.msra.mxu0 %v1826_v3  ;;  %v384_v34 = vmul.bf16 1050295962, %v368_v32  ;;  %v369_v36 = vld [vmem:[%s2543_s8 + $0x20] sm:$0xf]  ;;  %v370_v37 = vld [vmem:[%s2543_s8 + $0x24] sm:$0xf]  ;;  %s3063_s26 = smov %s3062_s21 }
  0xc5   : > { %1608 = vmatprep.subr.bf16.mxu0 %v1827_v4  ;;  %v1509_v30 = vcombine.low %v381_v28, %v382_v29  ;;  %v385_v38 = vmul.bf16 1050295962, %v369_v36  ;;  %v386_v39 = vmul.bf16 1050295962, %v370_v37  ;;  %v371_v41 = vld [vmem:[%s2543_s8 + $0x28] sm:$0xf] }
  0xc6   : > { %v1510_v35 = vcombine.low %v383_v33, %v384_v34  ;;  %v372_v42 = vld [vmem:[%s2543_s8 + $0x2c] sm:$0xf]  ;;  %v387_v43 = vmul.bf16 1050295962, %v371_v41  ;;  %v373_v46 = vld [vmem:[%s2543_s8 + $0x30] sm:$0xf] }
  0xc7   : > { %v1511_v40 = vcombine.low %v385_v38, %v386_v39  ;;  %v388_v44 = vmul.bf16 1050295962, %v372_v42  ;;  %v374_v47 = vld [vmem:[%s2543_s8 + $0x34] sm:$0xf]  ;;  %v389_v48 = vmul.bf16 1050295962, %v373_v46 }
  0xc8   : > { %v390_v49 = vmul.bf16 1050295962, %v374_v47  ;;  %v375_v51 = vld [vmem:[%s2543_s8 + $0x38] sm:$0xf]  ;;  %v376_v52 = vld [vmem:[%s2543_s8 + $0x3c] sm:$0xf] }
  0xc9   : > { %v1512_v45 = vcombine.low %v387_v43, %v388_v44  ;;  %v391_v53 = vmul.bf16 1050295962, %v375_v51  ;;  %v392_v54 = vmul.bf16 1050295962, %v376_v52  ;;  %v1840_v41 = vld [vmem:[%s2558_s6] sm:$0xff]   ;;  %v1841_v42 = vld [vmem:[%s2558_s6 + $0x48] sm:$0xff]  }
  0xca   : > { %v1513_v50 = vcombine.low %v389_v48, %v390_v49  ;;  %v1842_v43 = vld [vmem:[%s2558_s6 + $0x8] sm:$0xff]   ;;  %v1843_v44 = vld [vmem:[%s2558_s6 + $0x50] sm:$0xff]   ;;  %s1597_s7 = sshll.u32 %s3060_s4, 5  ;;  %p3064_p4 = scmp.ne.s32.totalorder %s3061_s1, 0 }
  0xcb   : > { %v1514_v55 = vcombine.low %v391_v53, %v392_v54  ;;  %s1320_s8 = sadd.s32 %s1597_s7, %s1596_s15 }
  0xcc   : > { %1609 = vmatpush3.bf16.xpose.msra.mxu0 %v1828_v5  ;;  %s1598_s0 = sshll.u32 %s1320_s8, 7 }
  0xcd   : > { %1610 = vmatprep.subr.bf16.mxu0 %v1829_v6  ;;  %s2926_s5 = scalar_lea.hbm %s3062_s21, %s1598_s0 }
  0xd4   : > { %1611 = vmatpush3.bf16.xpose.msra.mxu0 %v1830_v12 }
  0xd5   : > { %1612 = vmatprep.subr.bf16.mxu0 %v1831_v13 }
  0xdc   : > { %1613 = vmatpush3.bf16.xpose.msra.mxu0 %v1832_v14 }
  0xdd   : > { %1614 = vmatprep.subr.bf16.mxu0 %v1833_v15 }
  0xe4   : > { %1615 = vmatpush3.bf16.xpose.msra.mxu0 %v1834_v16 }
  0xe5   : > { %1616 = vmatprep.subr.bf16.mxu0 %v1835_v17 }
  0xec   : > { %1617 = vmatpush3.bf16.xpose.msra.mxu0 %v1836_v18 }
  0xed   : > { %1618 = vmatprep.subr.bf16.mxu0 %v1837_v19 }
  0xf4   : > { %1619 = vmatpush3.bf16.xpose.msra.mxu0 %v1838_v20 }
  0xfb   : > { %1621 = vmatmul.mubr.bf16.vlgmr.msra.gmra.mrb[0].mxu0 %v1507_v11 }
  0xfc   : > { %1622 = vmatprep.mubr.bf16.mxu0 %v1508_v25 }
 0x103   : > { %1623 = vmatmul.mubr.bf16.gmra.mrb[4].mxu0 %v1508_v25 }
 0x104   : > { %1624 = vmatprep.mubr.bf16.mxu0 %v1509_v30 }
 0x10b   : > { %1625 = vmatmul.mubr.bf16.gmra.mrb[8].mxu0 %v1509_v30 }
 0x10c   : > { %1626 = vmatprep.mubr.bf16.mxu0 %v1510_v35 }
 0x113   : > { %1627 = vmatmul.mubr.bf16.gmra.mrb[12].mxu0 %v1510_v35 }
 0x114   : > { %1628 = vmatprep.mubr.bf16.mxu0 %v1511_v40 }
 0x11b   : > { %1629 = vmatmul.mubr.bf16.gmra.mrb[16].mxu0 %v1511_v40  ;;  %v1839_v40 = vld [vmem:[%s2558_s6 + $0x40] sm:$0xff]  }
 0x11c   : > { %1630 = vmatprep.mubr.bf16.mxu0 %v1512_v45  ;;  %1636 = vmatprep.subr.bf16.mxu1 %v1839_v40 }
 0x11d   : > { %1637 = vmatpush3.bf16.msra.mxu1 %v1840_v41 }
 0x11e   : > { %1638 = vmatprep.subr.bf16.mxu1 %v1841_v42 }
 0x121   : > { %1639 = vmatpush3.bf16.msra.mxu1 %v1842_v43 }
 0x122   : > { %1640 = vmatprep.subr.bf16.mxu1 %v1843_v44 }
 0x123   : > { %1631 = vmatmul.mubr.bf16.gmra.mrb[20].mxu0 %v1512_v45  ;;  %v1844_v45 = vld [vmem:[%s2558_s6 + $0x10] sm:$0xff]  }
 0x124   : > { %1632 = vmatprep.mubr.bf16.mxu0 %v1513_v50 }
 0x125   : > { %1641 = vmatpush3.bf16.msra.mxu1 %v1844_v45 }
 0x12b   : > { %1633 = vmatmul.mubr.bf16.gmra.mrb[24].mxu0 %v1513_v50 }
 0x12c   : > { %1634 = vmatprep.mubr.bf16.mxu0 %v1514_v55 }
 0x133   : > { %1635 = vmatmul.mubr.bf16.gmra.mrb[28].mxu0 %v1514_v55 }
 0x1ce   : > { %v2599_v56 = vpop.f32.mrb[0].mxu0 }
 0x1cf   : > { %v2601_v57 = vpop.f32.mrb[1].mxu0 }
 0x1d0   : > { %v2603_v58 = vpop.f32.mrb[2].mxu0  ;;  %v714_v59 = vmax.f32 %v2599_v56, %v2601_v57 }
 0x1d1   : > { %v2607_v60 = vpop.f32.mrb[3].mxu0 }
 0x1d2   : > { %715 = vmax.xlane.f32.xlu0 %v714_v59  ;;  %v717_v61 = vmax.f32 %v2603_v58, %v2607_v60 }
 0x1d6   : > { %718 = vmax.xlane.f32.xlu0 %v717_v61  ;;  %v2611_v62 = vpop.f32.mrb[4].mxu0 }
 0x1d7   : > { %v2613_v63 = vpop.f32.mrb[5].mxu0 }
 0x1d8   : > { %v2615_v0 = vpop.f32.mrb[6].mxu0  ;;  %v720_v1 = vmax.f32 %v2611_v62, %v2613_v63 }
 0x1d9   : > { %v2619_v2 = vpop.f32.mrb[7].mxu0 }
 0x1da   : > { %721 = vmax.xlane.f32.xlu1 %v720_v1  ;;  %v723_v3 = vmax.f32 %v2615_v0, %v2619_v2 }
 0x1de   : > { %724 = vmax.xlane.f32.xlu1 %v723_v3  ;;  %v2623_v4 = vpop.f32.mrb[8].mxu0 }
 0x1df   : > { %v2625_v5 = vpop.f32.mrb[9].mxu0 }
 0x1e0   : > { %v2627_v6 = vpop.f32.mrb[10].mxu0  ;;  %v726_v7 = vmax.f32 %v2623_v4, %v2625_v5 }
 0x1e1   : > { %v2631_v8 = vpop.f32.mrb[11].mxu0 }
 0x1e2   : > { %727 = vmax.xlane.f32.xlu0 %v726_v7  ;;  %v729_v9 = vmax.f32 %v2627_v6, %v2631_v8 }
 0x1e4   : > { %730 = vmax.xlane.f32.xlu1 %v729_v9 }
 0x1e6   : > { %v2635_v10 = vpop.f32.mrb[12].mxu0 }
 0x1e7   : > { %v2637_v11 = vpop.f32.mrb[13].mxu0 }
 0x1e8   : > { %v2639_v12 = vpop.f32.mrb[14].mxu0  ;;  %v732_v13 = vmax.f32 %v2635_v10, %v2637_v11 }
 0x1e9   : > { %v2643_v14 = vpop.f32.mrb[15].mxu0 }
 0x1ea   : > { %733 = vmax.xlane.f32.xlu0 %v732_v13  ;;  %v735_v15 = vmax.f32 %v2639_v12, %v2643_v14 }
 0x1ec   : > { %736 = vmax.xlane.f32.xlu1 %v735_v15 }
 0x1ee   : > { %v2647_v16 = vpop.f32.mrb[16].mxu0 }
 0x1ef   : > { %v2649_v17 = vpop.f32.mrb[17].mxu0 }
 0x1f0   : > { %v2651_v18 = vpop.f32.mrb[18].mxu0  ;;  %v738_v19 = vmax.f32 %v2647_v16, %v2649_v17 }
 0x1f1   : > { %v2655_v20 = vpop.f32.mrb[19].mxu0 }
 0x1f2   : > { %739 = vmax.xlane.f32.xlu0 %v738_v19  ;;  %v741_v21 = vmax.f32 %v2651_v18, %v2655_v20 }
 0x1f4   : > { %742 = vmax.xlane.f32.xlu1 %v741_v21 }
 0x1f6   : > { %v2659_v22 = vpop.f32.mrb[20].mxu0 }
 0x1f7   : > { %v2661_v23 = vpop.f32.mrb[21].mxu0 }
 0x1f8   : > { %v2663_v24 = vpop.f32.mrb[22].mxu0  ;;  %v744_v25 = vmax.f32 %v2659_v22, %v2661_v23 }
 0x1f9   : > { %v2667_v26 = vpop.f32.mrb[23].mxu0 }
 0x1fa   : > { %745 = vmax.xlane.f32.xlu0 %v744_v25  ;;  %v747_v27 = vmax.f32 %v2663_v24, %v2667_v26 }
 0x1fc   : > { %748 = vmax.xlane.f32.xlu1 %v747_v27 }
 0x1fe   : > { %v2671_v28 = vpop.f32.mrb[24].mxu0 }
 0x1ff   : > { %v2673_v29 = vpop.f32.mrb[25].mxu0 }
 0x200   : > { %v2675_v30 = vpop.f32.mrb[26].mxu0  ;;  %v750_v31 = vmax.f32 %v2671_v28, %v2673_v29 }
 0x201   : > { %v2679_v32 = vpop.f32.mrb[27].mxu0 }
 0x202   : > { %751 = vmax.xlane.f32.xlu0 %v750_v31  ;;  %v753_v33 = vmax.f32 %v2675_v30, %v2679_v32 }
 0x204   : > { %754 = vmax.xlane.f32.xlu1 %v753_v33 }
 0x206   : > { %v2683_v34 = vpop.f32.mrb[28].mxu0 }
 0x207   : > { %v2685_v35 = vpop.f32.mrb[29].mxu0 }
 0x208   : > { %v2687_v36 = vpop.f32.mrb[30].mxu0  ;;  %v756_v37 = vmax.f32 %v2683_v34, %v2685_v35 }
 0x209   : > { %v2691_v38 = vpop.f32.mrb[31].mxu0 }
 0x20a   : > { %v759_v39 = vmax.f32 %v2687_v36, %v2691_v38  ;;  %757 = vmax.xlane.f32.xlu0 %v756_v37 }
 0x20c   : > { %760 = vmax.xlane.f32.xlu1 %v759_v39 }
 0x25f   : > { %v716_v46 = vpop.xlane.xlu0 %715 }
 0x260   : > { %v762_v47 = vsub.f32 %v2599_v56, %v716_v46  ;;  %v763_v48 = vsub.f32 %v2601_v57, %v716_v46 }
 0x262   : > { %v794_v49 = vmul.f32 1.442695, %v762_v47  ;;  %v796_v50 = vmul.f32 1.442695, %v763_v48 }
 0x263   : > { %v719_v51 = vpop.xlane.xlu0 %718 }
 0x264   : > { %1855 = vpow2.f32 %v794_v49  ;;  %v764_v52 = vsub.f32 %v2603_v58, %v719_v51  ;;  %v765_v53 = vsub.f32 %v2607_v60, %v719_v51 }
 0x265   : > { %1857 = vpow2.f32 %v796_v50 }
 0x266   : > { %v798_v54 = vmul.f32 1.442695, %v764_v52  ;;  %v800_v55 = vmul.f32 1.442695, %v765_v53 }
 0x267   : > { %v722_v59 = vpop.xlane.xlu1 %721 }
 0x268   : > { %1859 = vpow2.f32 %v798_v54  ;;  %v766_v61 = vsub.f32 %v2611_v62, %v722_v59  ;;  %v767_v1 = vsub.f32 %v2613_v63, %v722_v59 }
 0x269   : > { %1861 = vpow2.f32 %v800_v55 }
 0x26a   : > { %v802_v56 = vmul.f32 1.442695, %v766_v61  ;;  %v804_v57 = vmul.f32 1.442695, %v767_v1 }
 0x26b   : > { %v725_v3 = vpop.xlane.xlu1 %724 }
 0x26c   : > { %1863 = vpow2.f32 %v802_v56  ;;  %v768_v7 = vsub.f32 %v2615_v0, %v725_v3  ;;  %v769_v58 = vsub.f32 %v2619_v2, %v725_v3  ;;  %v1845_v56 = vld [vmem:[%s2558_s6 + $0x58] sm:$0xff]  }
 0x26d   : > { %1865 = vpow2.f32 %v804_v57  ;;  %1642 = vmatprep.subr.bf16.mxu1 %v1845_v56 }
 0x26e   : > { %v2709_v60 = vpop.eup %1855  ;;  %v806_v9 = vmul.f32 1.442695, %v768_v7  ;;  %v808_v13 = vmul.f32 1.442695, %v769_v58 }
 0x26f   : > { %v2711_v15 = vpop.eup %1857  ;;  %v728_v19 = vpop.xlane.xlu0 %727 }
 0x270   : > { %1867 = vpow2.f32 %v806_v9  ;;  %v770_v62 = vsub.f32 %v2623_v4, %v728_v19  ;;  %v771_v63 = vsub.f32 %v2625_v5, %v728_v19  ;;  %v858_v21 = vadd.f32 %v2711_v15, %v2709_v60  ;;  %v1846_v9 = vld [vmem:[%s2558_s6 + $0x18] sm:$0xff]   ;;  %v1847_v19 = vld [vmem:[%s2558_s6 + $0x60] sm:$0xff]  }
 0x271   : > { %1869 = vpow2.f32 %v808_v13  ;;  %v731_v0 = vpop.xlane.xlu1 %730  ;;  %1643 = vmatpush3.bf16.msra.mxu1 %v1846_v9 }
 0x272   : > { %v2717_v25 = vpop.eup %1859  ;;  %v810_v2 = vmul.f32 1.442695, %v770_v62  ;;  %v812_v27 = vmul.f32 1.442695, %v771_v63  ;;  %v772_v31 = vsub.f32 %v2627_v6, %v731_v0  ;;  %v773_v33 = vsub.f32 %v2631_v8, %v731_v0  ;;  %859 = vadd.xlane.f32.xlu0 %v858_v21  ;;  %1644 = vmatprep.subr.bf16.mxu1 %v1847_v19 }
 0x273   : > { %v2721_v37 = vpop.eup %1861 }
 0x274   : > { %1871 = vpow2.f32 %v810_v2  ;;  %v814_v4 = vmul.f32 1.442695, %v772_v31  ;;  %v816_v39 = vmul.f32 1.442695, %v773_v33  ;;  %v861_v5 = vadd.f32 %v2721_v37, %v2717_v25 }
 0x275   : > { %1873 = vpow2.f32 %v812_v27 }
 0x276   : > { %v2725_v40 = vpop.eup %1863  ;;  %1875 = vpow2.f32 %v814_v4  ;;  %862 = vadd.xlane.f32.xlu1 %v861_v5  ;;  %v1849_v4 = vld [vmem:[%s2558_s6 + $0x68] sm:$0xff]  }
 0x277   : > { %v2727_v41 = vpop.eup %1865  ;;  %1877 = vpow2.f32 %v816_v39  ;;  %v734_v6 = vpop.xlane.xlu0 %733 }
 0x278   : > { %v774_v8 = vsub.f32 %v2635_v10, %v734_v6  ;;  %v775_v42 = vsub.f32 %v2637_v11, %v734_v6  ;;  %v864_v43 = vadd.f32 %v2727_v41, %v2725_v40 }
 0x279   : > { %v737_v44 = vpop.xlane.xlu1 %736 }
 0x27a   : > { %v2733_v45 = vpop.eup %1867  ;;  %v818_v46 = vmul.f32 1.442695, %v774_v8  ;;  %v820_v47 = vmul.f32 1.442695, %v775_v42  ;;  %v776_v48 = vsub.f32 %v2639_v12, %v737_v44  ;;  %v777_v49 = vsub.f32 %v2643_v14, %v737_v44  ;;  %865 = vadd.xlane.f32.xlu0 %v864_v43  ;;  %v1851_v44 = vld [vmem:[%s2558_s6 + $0x70] sm:$0xff]  }
 0x27b   : > { %v2737_v50 = vpop.eup %1869 }
 0x27c   : > { %1879 = vpow2.f32 %v818_v46  ;;  %v822_v51 = vmul.f32 1.442695, %v776_v48  ;;  %v824_v10 = vmul.f32 1.442695, %v777_v49  ;;  %v867_v11 = vadd.f32 %v2737_v50, %v2733_v45 }
 0x27d   : > { %1881 = vpow2.f32 %v820_v47 }
 0x27e   : > { %v2741_v52 = vpop.eup %1871  ;;  %1883 = vpow2.f32 %v822_v51  ;;  %868 = vadd.xlane.f32.xlu1 %v867_v11 }
 0x27f   : > { %v2743_v53 = vpop.eup %1873  ;;  %1885 = vpow2.f32 %v824_v10  ;;  %v740_v12 = vpop.xlane.xlu0 %739 }
 0x280   : > { %v2745_v14 = vpop.eup %1875  ;;  %v778_v54 = vsub.f32 %v2647_v16, %v740_v12  ;;  %v779_v55 = vsub.f32 %v2649_v17, %v740_v12  ;;  %v870_v59 = vadd.f32 %v2743_v53, %v2741_v52 }
 0x281   : > { %v2751_v61 = vpop.eup %1877  ;;  %v743_v1 = vpop.xlane.xlu1 %742 }
 0x282   : > { %v826_v57 = vmul.f32 1.442695, %v778_v54  ;;  %v828_v3 = vmul.f32 1.442695, %v779_v55  ;;  %v780_v7 = vsub.f32 %v2651_v18, %v743_v1  ;;  %v781_v58 = vsub.f32 %v2655_v20, %v743_v1  ;;  %871 = vadd.xlane.f32.xlu0 %v870_v59  ;;  %v1848_v18 = vld [vmem:[%s2558_s6 + $0x20] sm:$0xff]   ;;  %v1853_v54 = vld [vmem:[%s2558_s6 + $0x78] sm:$0xff]  }
 0x283   : > { %v873_v16 = vadd.f32 %v2751_v61, %v2745_v14  ;;  %1645 = vmatpush3.bf16.msra.mxu1 %v1848_v18 }
 0x284   : > { %1887 = vpow2.f32 %v826_v57  ;;  %v830_v17 = vmul.f32 1.442695, %v780_v7  ;;  %v832_v13 = vmul.f32 1.442695, %v781_v58  ;;  %1646 = vmatprep.subr.bf16.mxu1 %v1849_v4  ;;  %v1854_v57 = vld [vmem:[%s2558_s6 + $0x38] sm:$0xff]  }
 0x285   : > { %1889 = vpow2.f32 %v828_v3  ;;  %874 = vadd.xlane.f32.xlu1 %v873_v16 }
 0x286   : > { %v2760_v62 = vpop.eup %1879  ;;  %1891 = vpow2.f32 %v830_v17 }
 0x287   : > { %v2763_v63 = vpop.eup %1881  ;;  %1893 = vpow2.f32 %v832_v13  ;;  %v746_v20 = vpop.xlane.xlu0 %745 }
 0x288   : > { %v2765_v21 = vpop.eup %1883  ;;  %v782_v0 = vsub.f32 %v2659_v22, %v746_v20  ;;  %v783_v2 = vsub.f32 %v2661_v23, %v746_v20  ;;  %v876_v27 = vadd.f32 %v2763_v63, %v2760_v62  ;;  %v1850_v22 = vld [vmem:[%s2558_s6 + $0x28] sm:$0xff]  }
 0x289   : > { %v2771_v31 = vpop.eup %1885  ;;  %v749_v33 = vpop.xlane.xlu1 %748  ;;  %1647 = vmatpush3.bf16.msra.mxu1 %v1850_v22 }
 0x28a   : > { %v834_v39 = vmul.f32 1.442695, %v782_v0  ;;  %v836_v5 = vmul.f32 1.442695, %v783_v2  ;;  %v784_v6 = vsub.f32 %v2663_v24, %v749_v33  ;;  %v785_v8 = vsub.f32 %v2667_v26, %v749_v33  ;;  %877 = vadd.xlane.f32.xlu0 %v876_v27  ;;  %v1852_v24 = vld [vmem:[%s2558_s6 + $0x30] sm:$0xff]   ;;  %1648 = vmatprep.subr.bf16.mxu1 %v1851_v44  ;;  %s2071_s6 = scalar_lea.vmem %s2928_s9, 2048 }
 0x28b   : > { %v879_v23 = vadd.f32 %v2771_v31, %v2765_v21  ;;  %p2072_p6 = scmp.ne.s32.totalorder %s2928_s9, %s2071_s6 }
 0x28c   : > { %1895 = vpow2.f32 %v834_v39  ;;  %v838_v42 = vmul.f32 1.442695, %v784_v6  ;;  %v840_v43 = vmul.f32 1.442695, %v785_v8 }
 0x28d   : > { %1897 = vpow2.f32 %v836_v5  ;;  %880 = vadd.xlane.f32.xlu1 %v879_v23  ;;  %1649 = vmatpush3.bf16.msra.mxu1 %v1852_v24  ;;  %p2073_p1 = pnand %p2072_p6, %p3064_p4 }
 0x28e   : > { %v2780_v46 = vpop.eup %1887  ;;  %1899 = vpow2.f32 %v838_v42  ;;  %1650 = vmatprep.subr.bf16.mxu1 %v1853_v54 }
 0x28f   : > { %v2783_v47 = vpop.eup %1889  ;;  %1901 = vpow2.f32 %v840_v43  ;;  %v752_v26 = vpop.xlane.xlu0 %751  ;;  %p2074_p2 = pneg %p2073_p1 }
 0x290   : > { %v2785_v48 = vpop.eup %1891  ;;  %v786_v49 = vsub.f32 %v2671_v28, %v752_v26  ;;  %v787_v51 = vsub.f32 %v2673_v29, %v752_v26  ;;  %v882_v10 = vadd.f32 %v2783_v47, %v2780_v46 }
 0x291   : > { %v2791_v11 = vpop.eup %1893  ;;  %v755_v12 = vpop.xlane.xlu1 %754  ;;  %1651 = vmatpush3.bf16.msra.mxu1 %v1854_v57 }
 0x292   : > { %v842_v55 = vmul.f32 1.442695, %v786_v49  ;;  %v844_v59 = vmul.f32 1.442695, %v787_v51  ;;  %v788_v1 = vsub.f32 %v2675_v30, %v755_v12  ;;  %v789_v56 = vsub.f32 %v2679_v32, %v755_v12  ;;  %883 = vadd.xlane.f32.xlu0 %v882_v10 }
 0x293   : > { %v885_v28 = vadd.f32 %v2791_v11, %v2785_v48 }
 0x294   : > { %1903 = vpow2.f32 %v842_v55  ;;  %v846_v29 = vmul.f32 1.442695, %v788_v1  ;;  %v848_v3 = vmul.f32 1.442695, %v789_v56  ;;  %v955_v55 = vld [vmem:[%s2561_s11 + $0x8] sm:$0xff]  ;;  %v954_v1 = vld [vmem:[%s2561_s11] sm:$0xff] }
 0x295   : > { %1905 = vpow2.f32 %v844_v59  ;;  %886 = vadd.xlane.f32.xlu1 %v885_v28  ;;  %v957_v59 = vld [vmem:[%s2561_s11 + $0x18] sm:$0xff]  ;;  %v956_v56 = vld [vmem:[%s2561_s11 + $0x10] sm:$0xff]  ;;  %vm987_vm0 = vcmp.ge.u32.totalorder %v955_v55, 1288490189  ;;  %vm986_vm2 = vcmp.ge.u32.totalorder %v954_v1, 1288490189 }
 0x296   : > { %v2799_v7 = vpop.eup %1895  ;;  %1907 = vpow2.f32 %v846_v29  ;;  %vm989_vm1 = vcmp.ge.u32.totalorder %v957_v59, 1288490189  ;;  %vm988_vm3 = vcmp.ge.u32.totalorder %v956_v56, 1288490189 }
 0x297   : > { %v2801_v58 = vpop.eup %1897  ;;  %1909 = vpow2.f32 %v848_v3  ;;  %v758_v30 = vpop.xlane.xlu0 %757  ;;  %vm1547_vm4 = vmpackc.low %vm989_vm1, %vm987_vm0 }
 0x298   : > { %v2803_v32 = vpop.eup %1899  ;;  %v790_v9 = vsub.f32 %v2683_v34, %v758_v30  ;;  %v791_v16 = vsub.f32 %v2685_v35, %v758_v30  ;;  %v888_v17 = vadd.f32 %v2801_v58, %v2799_v7  ;;  %vm1550_vm5 = vmpackc.low %vm988_vm3, %vm986_vm2 }
 0x299   : > { %v2809_v13 = vpop.eup %1901  ;;  %v761_v19 = vpop.xlane.xlu1 %760 }
 0x29a   : > { %v850_v18 = vmul.f32 1.442695, %v790_v9  ;;  %v852_v20 = vmul.f32 1.442695, %v791_v16  ;;  %889 = vadd.xlane.f32.xlu0 %v888_v17  ;;  %v792_v0 = vsub.f32 %v2687_v36, %v761_v19  ;;  %v793_v2 = vsub.f32 %v2691_v38, %v761_v19 }
 0x29b   : > { %v891_v27 = vadd.f32 %v2809_v13, %v2803_v32 }
 0x29c   : > { %1911 = vpow2.f32 %v850_v18  ;;  %v854_v34 = vmul.f32 1.442695, %v792_v0  ;;  %v856_v33 = vmul.f32 1.442695, %v793_v2  ;;  %v959_v2 = vld [vmem:[%s2561_s11 + $0x28] sm:$0xff] }
 0x29d   : > { %1913 = vpow2.f32 %v852_v20  ;;  %892 = vadd.xlane.f32.xlu1 %v891_v27  ;;  %v961_v27 = vld [vmem:[%s2561_s11 + $0x38] sm:$0xff]  ;;  %vm991_vm6 = vcmp.ge.u32.totalorder %v959_v2, 1288490189 }
 0x29e   : > { %v2815_v35 = vpop.eup %1903  ;;  %1915 = vpow2.f32 %v854_v34  ;;  %v958_v34 = vld [vmem:[%s2561_s11 + $0x20] sm:$0xff]  ;;  %vm993_vm7 = vcmp.ge.u32.totalorder %v961_v27, 1288490189 }
 0x29f   : > { %v2817_v4 = vpop.eup %1905  ;;  %1917 = vpow2.f32 %v856_v33  ;;  %vm990_vm8 = vcmp.ge.u32.totalorder %v958_v34, 1288490189  ;;  %vm1553_vm10 = vmpackc.low %vm993_vm7, %vm991_vm6 }
 0x2a0   : > { %v2819_v39 = vpop.eup %1907  ;;  %v894_v36 = vadd.f32 %v2817_v4, %v2815_v35 }
 0x2a1   : > { %v2823_v38 = vpop.eup %1909 }
 0x2a2   : > { %895 = vadd.xlane.f32.xlu0 %v894_v36  ;;  %v897_v5 = vadd.f32 %v2823_v38, %v2819_v39 }
 0x2a4   : > { %898 = vadd.xlane.f32.xlu1 %v897_v5 }
 0x2a6   : > { %v2827_v6 = vpop.eup %1911 }
 0x2a7   : > { %v2829_v8 = vpop.eup %1913 }
 0x2a8   : > { %v2831_v22 = vpop.eup %1915  ;;  %v900_v23 = vadd.f32 %v2829_v8, %v2827_v6 }
 0x2a9   : > { %v2835_v42 = vpop.eup %1917 }
 0x2aa   : > { %901 = vadd.xlane.f32.xlu0 %v900_v23  ;;  %v903_v43 = vadd.f32 %v2835_v42, %v2831_v22 }
 0x2ac   : > { %904 = vadd.xlane.f32.xlu1 %v903_v43 }
 0x2ff   : > { %v860_v44 = vpop.xlane.xlu0 %859 }
 0x300   : > { %v906_v24 = vmul.f32 0.7, %v860_v44 }
 0x302   : > { %1919 = vrcp.f32 %v906_v24 }
 0x303   : > { %v863_v26 = vpop.xlane.xlu1 %862 }
 0x304   : > { %v907_v49 = vmul.f32 0.7, %v863_v26 }
 0x306   : > { %1921 = vrcp.f32 %v907_v49 }
 0x307   : > { %v866_v51 = vpop.xlane.xlu0 %865 }
 0x308   : > { %v908_v10 = vmul.f32 0.7, %v866_v51  ;;  %v963_v51 = vld [vmem:[%s2561_s11 + $0x48] sm:$0xff] }
 0x309   : > { %vm995_vm12 = vcmp.ge.u32.totalorder %v963_v51, 1288490189  ;;  %v977_v51 = vld [vmem:[%s2561_s11 + $0xb8] sm:$0xff] }
 0x30a   : > { %1923 = vrcp.f32 %v908_v10  ;;  %v965_v10 = vld [vmem:[%s2561_s11 + $0x58] sm:$0xff] }
 0x30b   : > { %v869_v12 = vpop.xlane.xlu1 %868  ;;  %vm997_vm13 = vcmp.ge.u32.totalorder %v965_v10, 1288490189 }
 0x30c   : > { %v909_v54 = vmul.f32 0.7, %v869_v12  ;;  %v1920_v57 = vpop.eup %1919  ;;  %v962_v12 = vld [vmem:[%s2561_s11 + $0x40] sm:$0xff]  ;;  %vm1559_vm0 = vmpackc.low %vm997_vm13, %vm995_vm12 }
 0x30d   : > { %v1019_v30 = vmul.f32 %v1920_v57, %v2711_v15  ;;  %v1018_v16 = vmul.f32 %v1920_v57, %v2709_v60  ;;  %v960_v15 = vld [vmem:[%s2561_s11 + $0x30] sm:$0xff]  ;;  %vm994_vm14 = vcmp.ge.u32.totalorder %v962_v12, 1288490189  ;;  %v974_v12 = vld [vmem:[%s2561_s11 + $0xa0] sm:$0xff] }
 0x30e   : > { %1925 = vrcp.f32 %v909_v54  ;;  %vm992_vm9 = vcmp.ge.u32.totalorder %v960_v15, 1288490189  ;;  %v964_v54 = vld [vmem:[%s2561_s11 + $0x50] sm:$0xff]  ;;  %v971_v15 = vld [vmem:[%s2561_s11 + $0x88] sm:$0xff] }
 0x30f   : > { %v872_v28 = vpop.xlane.xlu0 %871  ;;  %vm1556_vm11 = vmpackc.low %vm992_vm9, %vm990_vm8  ;;  %vm996_vm15 = vcmp.ge.u32.totalorder %v964_v54, 1288490189  ;;  %vm1003_vm8 = vcmp.ge.u32.totalorder %v971_v15, 1288490189 }
 0x310   : > { %v1922_v29 = vpop.eup %1921  ;;  %v910_v3 = vmul.f32 0.7, %v872_v28  ;;  %vm1562_vm1 = vmpackc.low %vm996_vm15, %vm994_vm14  ;;  %vm1009_vm15 = vcmp.ge.u32.totalorder %v977_v51, 1288490189 }
 0x311   : > { %v1021_v9 = vmul.f32 %v1922_v29, %v2721_v37  ;;  %v1020_v17 = vmul.f32 %v1922_v29, %v2717_v25 }
 0x312   : > { %v875_v19 = vpop.xlane.xlu1 %874  ;;  %1927 = vrcp.f32 %v910_v3  ;;  %v967_v3 = vld [vmem:[%s2561_s11 + $0x68] sm:$0xff] }
 0x313   : > { %v911_v18 = vmul.f32 0.7, %v875_v19  ;;  %v1548_v20 = vpack.c.bf16 %v1021_v9, %v1019_v30  ;;  %v1551_v0 = vpack.c.bf16 %v1020_v17, %v1018_v16  ;;  %v969_v30 = vld [vmem:[%s2561_s11 + $0x78] sm:$0xff]  ;;  %v966_v16 = vld [vmem:[%s2561_s11 + $0x60] sm:$0xff]  ;;  %v968_v17 = vld [vmem:[%s2561_s11 + $0x70] sm:$0xff] }
 0x314   : > { %v1924_v33 = vpop.eup %1923  ;;  %vm999_vm2 = vcmp.ge.u32.totalorder %v967_v3, 1288490189  ;;  %vm1001_vm3 = vcmp.ge.u32.totalorder %v969_v30, 1288490189 }
 0x315   : > { %1929 = vrcp.f32 %v911_v18  ;;  %1549 = vmatprep.mubr.msk.bf16.mxu1 %vm1547_vm4, %v1548_v20  ;;  %v1023_v36 = vmul.f32 %v1924_v33, %v2727_v41  ;;  %v1022_v23 = vmul.f32 %v1924_v33, %v2725_v40  ;;  %vm998_vm4 = vcmp.ge.u32.totalorder %v966_v16, 1288490189  ;;  %vm1565_vm6 = vmpackc.low %vm1001_vm3, %vm999_vm2  ;;  %v973_v33 = vld [vmem:[%s2561_s11 + $0x98] sm:$0xff] }
 0x316   : > { %1552 = vmatmul.mubr.msk.bf16.vlgmr.msra.gmra.mrb[0].mxu1 %vm1550_vm5, %v1551_v0  ;;  %vm1000_vm5 = vcmp.ge.u32.totalorder %v968_v17, 1288490189  ;;  %vm1005_vm9 = vcmp.ge.u32.totalorder %v973_v33, 1288490189  ;;  %v983_v17 = vld [vmem:[%s2561_s11 + $0xe8] sm:$0xff] }
 0x317   : > { %v878_v37 = vpop.xlane.xlu0 %877  ;;  %vm1568_vm7 = vmpackc.low %vm1000_vm5, %vm998_vm4 }
 0x318   : > { %v1926_v60 = vpop.eup %1925  ;;  %v912_v25 = vmul.f32 0.7, %v878_v37  ;;  %vm1571_vm12 = vmpackc.low %vm1005_vm9, %vm1003_vm8 }
 0x319   : > { %v1025_v5 = vmul.f32 %v1926_v60, %v2737_v50  ;;  %v1024_v43 = vmul.f32 %v1926_v60, %v2733_v45  ;;  %v970_v60 = vld [vmem:[%s2561_s11 + $0x80] sm:$0xff] }
 0x31a   : > { %v881_v44 = vpop.xlane.xlu1 %880  ;;  %1931 = vrcp.f32 %v912_v25  ;;  %v972_v25 = vld [vmem:[%s2561_s11 + $0x90] sm:$0xff] }
 0x31b   : > { %v913_v24 = vmul.f32 0.7, %v881_v44  ;;  %v1554_v26 = vpack.c.bf16 %v1025_v5, %v1023_v36  ;;  %v1557_v49 = vpack.c.bf16 %v1024_v43, %v1022_v23 }
 0x31c   : > { %v1928_v55 = vpop.eup %1927 }
 0x31d   : > { %1933 = vrcp.f32 %v913_v24  ;;  %1555 = vmatprep.mubr.msk.bf16.mxu1 %vm1553_vm10, %v1554_v26  ;;  %v1027_v50 = vmul.f32 %v1928_v55, %v2743_v53  ;;  %v1026_v28 = vmul.f32 %v1928_v55, %v2741_v52  ;;  %vm1002_vm10 = vcmp.ge.u32.totalorder %v970_v60, 1288490189 }
 0x31e   : > { %1558 = vmatmul.mubr.msk.bf16.gmra.mrb[4].mxu1 %vm1556_vm11, %v1557_v49  ;;  %vm1004_vm11 = vcmp.ge.u32.totalorder %v972_v25, 1288490189  ;;  %v975_v49 = vld [vmem:[%s2561_s11 + $0xa8] sm:$0xff] }
 0x31f   : > { %v1930_v40 = vpop.eup %1929  ;;  %v884_v41 = vpop.xlane.xlu0 %883  ;;  %vm1574_vm13 = vmpackc.low %vm1004_vm11, %vm1002_vm10  ;;  %vm1007_vm14 = vcmp.ge.u32.totalorder %v975_v49, 1288490189  ;;  %vm1015_vm10 = vcmp.ge.u32.totalorder %v983_v17, 1288490189 }
 0x320   : > { %v914_v45 = vmul.f32 0.7, %v884_v41  ;;  %v1029_v59 = vmul.f32 %v1930_v40, %v2751_v61  ;;  %v1028_v1 = vmul.f32 %v1930_v40, %v2745_v14  ;;  %vm1577_vm2 = vmpackc.low %vm1009_vm15, %vm1007_vm14 }
 0x322   : > { %v887_v56 = vpop.xlane.xlu1 %886  ;;  %v1560_v57 = vpack.c.bf16 %v1029_v59, %v1027_v50  ;;  %1935 = vrcp.f32 %v914_v45  ;;  %v1563_v9 = vpack.c.bf16 %v1028_v1, %v1026_v28 }
 0x323   : > { %v915_v29 = vmul.f32 0.7, %v887_v56  ;;  %v979_v56 = vld [vmem:[%s2561_s11 + $0xc8] sm:$0xff] }
 0x324   : > { %1561 = vmatprep.mubr.msk.bf16.mxu1 %vm1559_vm0, %v1560_v57  ;;  %v1932_v19 = vpop.eup %1931  ;;  %vm1006_vm0 = vcmp.ge.u32.totalorder %v974_v12, 1288490189  ;;  %v981_v57 = vld [vmem:[%s2561_s11 + $0xd8] sm:$0xff]  ;;  %vm1011_vm4 = vcmp.ge.u32.totalorder %v979_v56, 1288490189 }
 0x325   : > { %1937 = vrcp.f32 %v915_v29  ;;  %v1031_v61 = vmul.f32 %v1932_v19, %v2763_v63  ;;  %v1030_v27 = vmul.f32 %v1932_v19, %v2760_v62  ;;  %vm1013_vm5 = vcmp.ge.u32.totalorder %v981_v57, 1288490189  ;;  %v985_v19 = vld [vmem:[%s2561_s11 + $0xf8] sm:$0xff] }
 0x326   : > { %1564 = vmatmul.mubr.msk.bf16.gmra.mrb[8].mxu1 %vm1562_vm1, %v1563_v9  ;;  %vm1017_vm11 = vcmp.ge.u32.totalorder %v985_v19, 1288490189 }
 0x327   : > { %v1934_v53 = vpop.eup %1933  ;;  %v890_v14 = vpop.xlane.xlu0 %889 }
 0x328   : > { %v916_v52 = vmul.f32 0.7, %v890_v14  ;;  %v1033_v18 = vmul.f32 %v1934_v53, %v2771_v31  ;;  %v1032_v20 = vmul.f32 %v1934_v53, %v2765_v21 }
 0x32a   : > { %v893_v0 = vpop.xlane.xlu1 %892  ;;  %v1566_v2 = vpack.c.bf16 %v1033_v18, %v1031_v61  ;;  %1939 = vrcp.f32 %v916_v52  ;;  %v1569_v37 = vpack.c.bf16 %v1032_v20, %v1030_v27 }
 0x32b   : > { %v917_v34 = vmul.f32 0.7, %v893_v0 }
 0x32c   : > { %1567 = vmatprep.mubr.msk.bf16.mxu1 %vm1565_vm6, %v1566_v2  ;;  %v1936_v36 = vpop.eup %1935  ;;  %vm1583_vm6 = vmpackc.low %vm1013_vm5, %vm1011_vm4 }
 0x32d   : > { %1941 = vrcp.f32 %v917_v34  ;;  %v1035_v31 = vmul.f32 %v1936_v36, %v2783_v47  ;;  %v1034_v26 = vmul.f32 %v1936_v36, %v2780_v46  ;;  %v976_v47 = vld [vmem:[%s2561_s11 + $0xb0] sm:$0xff] }
 0x32e   : > { %1570 = vmatmul.mubr.msk.bf16.gmra.mrb[12].mxu1 %vm1568_vm7, %v1569_v37  ;;  %vm1008_vm1 = vcmp.ge.u32.totalorder %v976_v47, 1288490189 }
 0x32f   : > { %v1938_v63 = vpop.eup %1937  ;;  %v896_v21 = vpop.xlane.xlu0 %895  ;;  %vm1580_vm3 = vmpackc.low %vm1008_vm1, %vm1006_vm0 }
 0x330   : > { %v918_v62 = vmul.f32 0.7, %v896_v21  ;;  %v1037_v5 = vmul.f32 %v1938_v63, %v2791_v11  ;;  %v1036_v23 = vmul.f32 %v1938_v63, %v2785_v48 }
 0x331   : > { %v899_v43 = vpop.xlane.xlu1 %898 }
 0x332   : > { %1943 = vrcp.f32 %v918_v62  ;;  %v919_v44 = vmul.f32 0.7, %v899_v43  ;;  %v1572_v24 = vpack.c.bf16 %v1037_v5, %v1035_v31  ;;  %v1575_v10 = vpack.c.bf16 %v1036_v23, %v1034_v26 }
 0x334   : > { %1945 = vrcp.f32 %v919_v44  ;;  %1573 = vmatprep.mubr.msk.bf16.mxu1 %vm1571_vm12, %v1572_v24  ;;  %v1940_v54 = vpop.eup %1939  ;;  %vm1589_vm12 = vmpackc.low %vm1017_vm11, %vm1015_vm10 }
 0x335   : > { %v1039_v46 = vmul.f32 %v1940_v54, %v2801_v58  ;;  %v1038_v1 = vmul.f32 %v1940_v54, %v2799_v7 }
 0x336   : > { %1576 = vmatmul.mubr.msk.bf16.gmra.mrb[16].mxu1 %vm1574_vm13, %v1575_v10 }
 0x337   : > { %v1942_v48 = vpop.eup %1941  ;;  %v902_v11 = vpop.xlane.xlu0 %901 }
 0x338   : > { %v920_v55 = vmul.f32 0.7, %v902_v11  ;;  %v1041_v40 = vmul.f32 %v1942_v48, %v2809_v13  ;;  %v1040_v41 = vmul.f32 %v1942_v48, %v2803_v32  ;;  %v978_v32 = vld [vmem:[%s2561_s11 + $0xc0] sm:$0xff]  ;;  %v980_v13 = vld [vmem:[%s2561_s11 + $0xd0] sm:$0xff] }
 0x339   : > { %v905_v45 = vpop.xlane.xlu1 %904  ;;  %vm1010_vm7 = vcmp.ge.u32.totalorder %v978_v32, 1288490189  ;;  %vm1012_vm8 = vcmp.ge.u32.totalorder %v980_v13, 1288490189 }
 0x33a   : > { %1947 = vrcp.f32 %v920_v55  ;;  %v921_v50 = vmul.f32 0.7, %v905_v45  ;;  %v1578_v59 = vpack.c.bf16 %v1041_v40, %v1039_v46  ;;  %v1581_v58 = vpack.c.bf16 %v1040_v41, %v1038_v1  ;;  %vm1586_vm9 = vmpackc.low %vm1012_vm8, %vm1010_vm7 }
 0x33c   : > { %v1944_v28 = vpop.eup %1943  ;;  %1949 = vrcp.f32 %v921_v50  ;;  %1579 = vmatprep.mubr.msk.bf16.mxu1 %vm1577_vm2, %v1578_v59 }
 0x33d   : > { %v1043_v3 = vmul.f32 %v1944_v28, %v2817_v4  ;;  %v1042_v16 = vmul.f32 %v1944_v28, %v2815_v35  ;;  %v982_v4 = vld [vmem:[%s2561_s11 + $0xe0] sm:$0xff] }
 0x33e   : > { %v1946_v29 = vpop.eup %1945  ;;  %1582 = vmatmul.mubr.msk.bf16.gmra.mrb[20].mxu1 %vm1580_vm3, %v1581_v58  ;;  %vm1014_vm13 = vcmp.ge.u32.totalorder %v982_v4, 1288490189 }
 0x33f   : > { %v1045_v7 = vmul.f32 %v1946_v29, %v2823_v38  ;;  %v1044_v30 = vmul.f32 %v1946_v29, %v2819_v39  ;;  %v984_v38 = vld [vmem:[%s2561_s11 + $0xf0] sm:$0xff]  ;;  %s2075_s11 = sshll.u32 %s2211_s29, 4  ;;  %s2076_s11 = int_to_ptr.vmem [resolvable:$false] %s2075_s11 }
 0x340   : > { %vm1016_vm14 = vcmp.ge.u32.totalorder %v984_v38, 1288490189  ;;  %s2077_s27 = scalar_lea.vmem %s2076_s11, 4096  ;;  %p2078_p3 = scmp.lt.s32.totalorder %s2928_s9, %s2076_s11 }
 0x341   : > { %v1584_v9 = vpack.c.bf16 %v1045_v7, %v1043_v3  ;;  %v1587_v14 = vpack.c.bf16 %v1044_v30, %v1042_v16  ;;  %vm1592_vm15 = vmpackc.low %vm1016_vm14, %vm1014_vm13  ;;  %p2079_p9 = scmp.lt.s32.totalorder %s2077_s27, %s2071_s6 }
 0x343   : > { %1585 = vmatprep.mubr.msk.bf16.mxu1 %vm1583_vm6, %v1584_v9  ;;  %p2080_p7 = por %p2079_p9, %p2078_p3 }
 0x344   : > { %v1948_v53 = vpop.eup %1947 }
 0x345   : > { %v1047_v61 = vmul.f32 %v1948_v53, %v2829_v8  ;;  %v1046_v20 = vmul.f32 %v1948_v53, %v2827_v6  ;;  %p2081_p8 = pnand %p2080_p7, %p2074_p2 }
 0x346   : > { %v1950_v52 = vpop.eup %1949  ;;  %1588 = vmatmul.mubr.msk.bf16.gmra.mrb[24].mxu1 %vm1586_vm9, %v1587_v14 }
 0x347   : > { %v1049_v39 = vmul.f32 %v1950_v52, %v2835_v42  ;;  %v1048_v35 = vmul.f32 %v1950_v52, %v2831_v22 }
 0x349   : > { %v1590_v18 = vpack.c.bf16 %v1049_v39, %v1047_v61  ;;  %v1593_v0 = vpack.c.bf16 %v1048_v35, %v1046_v20 }
 0x34b   : > { %1591 = vmatprep.mubr.msk.bf16.mxu1 %vm1589_vm12, %v1590_v18 }
 0x34e   : > { %1594 = vmatmul.mubr.msk.bf16.gmra.mrb[28].mxu1 %vm1592_vm15, %v1593_v0 }
 0x3e9   : > { %v1652_v2 = vpop.f32.mrb[0].mxu1 }
 0x3ea   : > { %v1653_v27 = vpop.f32.mrb[1].mxu1 }
 0x3eb   : > { %v1654_v34 = vadd.f32 %v1653_v27, %v1652_v2  ;;  %v1655_v15 = vpop.f32.mrb[2].mxu1 }
 0x3ec   : > { %v1656_v8 = vpop.f32.mrb[3].mxu1 }
 0x3ed   : > { %1291 = vst [vmem:[%s2904_s16] sm:$0xff] %v1654_v34  ;;  %v1657_v22 = vadd.f32 %v1656_v8, %v1655_v15 }
 0x3ef   : > { %1292 = vst [vmem:[%s2904_s16 + $0x8] sm:$0xff] %v1657_v22 }
 0x3f1   : > { %v1658_v6 = vpop.f32.mrb[4].mxu1 }
 0x3f2   : > { %v1659_v42 = vpop.f32.mrb[5].mxu1 }
 0x3f3   : > { %v1660_v33 = vadd.f32 %v1659_v42, %v1658_v6  ;;  %v1661_v37 = vpop.f32.mrb[6].mxu1 }
 0x3f4   : > { %v1662_v60 = vpop.f32.mrb[7].mxu1 }
 0x3f5   : > { %1293 = vst [vmem:[%s2904_s16 + $0x10] sm:$0xff] %v1660_v33  ;;  %v1663_v25 = vadd.f32 %v1662_v60, %v1661_v37 }
 0x3f7   : > { %1294 = vst [vmem:[%s2904_s16 + $0x18] sm:$0xff] %v1663_v25 }
 0x3f9   : > { %v1664_v36 = vpop.f32.mrb[8].mxu1 }
 0x3fa   : > { %v1665_v63 = vpop.f32.mrb[9].mxu1 }
 0x3fb   : > { %v1666_v21 = vadd.f32 %v1665_v63, %v1664_v36  ;;  %v1667_v62 = vpop.f32.mrb[10].mxu1 }
 0x3fc   : > { %v1668_v31 = vpop.f32.mrb[11].mxu1 }
 0x3fd   : > { %1295 = vst [vmem:[%s2904_s16 + $0x20] sm:$0xff] %v1666_v21  ;;  %v1669_v5 = vadd.f32 %v1668_v31, %v1667_v62 }
 0x3ff   : > { %1296 = vst [vmem:[%s2904_s16 + $0x28] sm:$0xff] %v1669_v5 }
 0x401   : > { %v1670_v23 = vpop.f32.mrb[12].mxu1 }
 0x402   : > { %v1671_v43 = vpop.f32.mrb[13].mxu1 }
 0x403   : > { %v1672_v44 = vadd.f32 %v1671_v43, %v1670_v23  ;;  %v1673_v24 = vpop.f32.mrb[14].mxu1 }
 0x404   : > { %v1674_v26 = vpop.f32.mrb[15].mxu1 }
 0x405   : > { %1297 = vst [vmem:[%s2904_s16 + $0x30] sm:$0xff] %v1672_v44  ;;  %v1675_v49 = vadd.f32 %v1674_v26, %v1673_v24 }
 0x407   : > { %1298 = vst [vmem:[%s2904_s16 + $0x38] sm:$0xff] %v1675_v49 }
 0x409   : > { %v1676_v51 = vpop.f32.mrb[16].mxu1 }
 0x40a   : > { %v1677_v10 = vpop.f32.mrb[17].mxu1 }
 0x40b   : > { %v1678_v12 = vadd.f32 %v1677_v10, %v1676_v51  ;;  %v1679_v47 = vpop.f32.mrb[18].mxu1 }
 0x40c   : > { %v1680_v54 = vpop.f32.mrb[19].mxu1 }
 0x40d   : > { %1299 = vst [vmem:[%s2904_s16 + $0x40] sm:$0xff] %v1678_v12  ;;  %v1681_v48 = vadd.f32 %v1680_v54, %v1679_v47 }
 0x40f   : > { %1300 = vst [vmem:[%s2904_s16 + $0x48] sm:$0xff] %v1681_v48 }
 0x411   : > { %v1682_v11 = vpop.f32.mrb[20].mxu1 }
 0x412   : > { %v1683_v55 = vpop.f32.mrb[21].mxu1 }
 0x413   : > { %v1684_v46 = vadd.f32 %v1683_v55, %v1682_v11  ;;  %v1685_v40 = vpop.f32.mrb[22].mxu1 }
 0x414   : > { %v1686_v41 = vpop.f32.mrb[23].mxu1 }
 0x415   : > { %1301 = vst [vmem:[%s2904_s16 + $0x50] sm:$0xff] %v1684_v46  ;;  %v1687_v45 = vadd.f32 %v1686_v41, %v1685_v40 }
 0x417   : > { %1302 = vst [vmem:[%s2904_s16 + $0x58] sm:$0xff] %v1687_v45 }
 0x419   : > { %v1688_v50 = vpop.f32.mrb[24].mxu1 }
 0x41a   : > { %v1689_v59 = vpop.f32.mrb[25].mxu1 }
 0x41b   : > { %v1690_v1 = vadd.f32 %v1689_v59, %v1688_v50  ;;  %v1691_v56 = vpop.f32.mrb[26].mxu1 }
 0x41c   : > { %v1692_v57 = vpop.f32.mrb[27].mxu1 }
 0x41d   : > { %1303 = vst [vmem:[%s2904_s16 + $0x60] sm:$0xff] %v1690_v1  ;;  %v1693_v28 = vadd.f32 %v1692_v57, %v1691_v56 }
 0x41f   : > { %1304 = vst [vmem:[%s2904_s16 + $0x68] sm:$0xff] %v1693_v28 }
 0x421   : > { %v1694_v58 = vpop.f32.mrb[28].mxu1 }
 0x422   : > { %v1695_v32 = vpop.f32.mrb[29].mxu1 }
 0x423   : > { %v1696_v13 = vadd.f32 %v1695_v32, %v1694_v58  ;;  %v1697_v29 = vpop.f32.mrb[30].mxu1 }
 0x424   : > { %v1698_v3 = vpop.f32.mrb[31].mxu1 }
 0x425   : > { %1305 = vst [vmem:[%s2904_s16 + $0x70] sm:$0xff] %v1696_v13  ;;  %v1699_v7 = vadd.f32 %v1698_v3, %v1697_v29 }
 0x427   : > { %1306 = vst [vmem:[%s2904_s16 + $0x78] sm:$0xff] %v1699_v7 }
 0x428   : > { %2084 = shalt.err (!%p2081_p8)
}
 0x429   : > { %s2085_s16 = scalar_lea.hbm %s2926_s5, 2048  ;;  %s2089_s15 = scalar_lea.hbm %s3063_s26, 8192 }
 0x42a   : > { %p2086_p11 = scmp.ne.s32.totalorder %s2926_s5, %s2085_s16  ;;  %p2090_p13 = scmp.lt.u32.totalorder %s2926_s5, %s3063_s26 }
 0x42b   : > { %p2091_p5 = scmp.lt.u32.totalorder %s2089_s15, %s2085_s16  ;;  %p2093_p6 = scmp.lt.u32.totalorder %s2085_s16, %s2926_s5 }
 0x42c   : > { %p2087_p0 = pnand %p2086_p11, %p3064_p4 }
 0x42d   : > { %p2092_p12 = por %p2091_p5, %p2090_p13 }
 0x42e   : > { %p2088_p10 = pneg %p2087_p0 }
 0x42f   : > { %p2094_p1 = por %p2093_p6, %p2092_p12 }
 0x431   : > { %p2095_p2 = pnand %p2094_p1, %p2088_p10 }
 0x433   : > { %2098 = shalt.err (!%p2095_p2)
}
 0x434   : > { %s2212_s0 = smov 128   ;;  %s2213_s13 = smov 8  }
 0x435   : > { %1708 = dma.vmem_to_hbm [thread:$0]  (%p3064_p4), %s2928_s9, 2048, %s2926_s5, %s1308_s14, %s2212_s0, %s2212_s0, %s2213_s13  }
 0x436 PF: > { %s3065_s30 = sld [smem:[#allocation16_spill]]  ;;  %p1728_p3 = scmp.ge.s32.totalorder %s2201_s25, 2 }
 0x437   : > { %p3066_p9 = scmp.ne.s32.totalorder %s3041_s10, 0 }
 0x439   : > { %p1724_p7 = pnand %p1728_p3, %p3066_p9 }
 0x43c   : > { %s1338_s21 = sand.u32 1, %s3065_s30  }
 0x43d   : > { %s1339_s6 = scalar_lea.sflag [#allocation4], %s1338_s21 }
 0x43e   : > { %2156 = dma.done.wait (!%p1724_p7), %s1339_s6, 2048  }
 0x43f   : > { %2158 = vsyncadd (!%p1724_p7), %s1339_s6, 4294965248  ;;  %s26_s25 = sadd.s32 1, %s2201_s25   ;;  %s3067_s15 = sld [smem:[#allocation15_spill]] }
 0x440   : > { %p23_p8 = scmp.ge.s32.totalorder %s26_s25, 6   ;;  %s3068_s28 = sld [smem:[#allocation21_spill]] }
 0x441   : > { %s3069_s1 = sld [smem:[#allocation22_spill]]  ;;  %s3070_s16 = smov %s2169_s17 }
 0x442   : > { %s3071_s17 = smov %s2417_s18  ;;  %s3072_s18 = smov %s2177_s19 }
 0x443   : > { %s3073_s19 = smov %s2181_s20  ;;  %s3074_s20 = smov %s2420_s22 }
 0x444   : > { %s3075_s21 = smov %s2193_s23  ;;  %s3076_s22 = smov %s2197_s24 }
 0x445   :  { %25 = sbr.rel (!%p23_p8) target bundleno = 17 (0x11), region = 118 }
 0x446   : > { %s3077_s23 = smov %s3068_s28 }
 0x447   : > { %s3078_s24 = smov %s3069_s1 }
 0x44c   :  { %1344 = vsyncpa [#allocation3], 1 }
 0x44d   :  { %1346 = vsyncpa [#allocation3 + $0x1], 1 }
 0x44e   :  { %1347 = vsyncpa [#allocation6], 1 }
 0x44f   :  { %1349 = vsyncpa [#allocation6 + $0x1], 1 }
 0x450   :  { %1350 = vsyncpa [#allocation9], 1 }
 0x451   :  { %1352 = vsyncpa [#allocation9 + $0x1], 1 }
 0x452   :  { %1353 = vsyncpa [#allocation4], 1 }
 0x453   :  { %1355 = vsyncpa [#allocation4 + $0x1], 1 }

</bundles_post_ra>
